<compile_context>
chip_gen: v6e
topology: v6e:2x2x1
jax: 0.10.0
libtpu: 0.0.40
codegen_flags: <defaults>
</compile_context>

<pallas_src>
import functools
import math

import jax
import jax.numpy as jnp
from jax.experimental import pallas as pl
from jax.experimental.pallas import tpu as pltpu


def _round_up(x, m):
    return ((x + m - 1) // m) * m


# ----------------------------- Pallas kernel --------------------------------


def fused_encoder_kernel(p_ref, wc_ref, wf_ref, b_ref, o_ref, acc_ref, *, inv_hw):
    """conv-as-matmul + ReLU + pooled-sum accumulate; fc head at last HW step.

    p_ref:   (Bt, hw_tile, K_pad)  bf16  im2col patches for this (batch, hw) tile
    wc_ref:  (K_pad, Cf_pad)       bf16  conv weight (zero-padded)
    wf_ref:  (Cf_pad, E_pad)       f32   replaced fc weight (zero-padded)
    b_ref:   (1, E_pad)            f32   fc bias (zero-padded)
    o_ref:   (Bt, E_pad)           f32   output rows for this batch block
    acc_ref: (Bt, Cf_pad)          f32   pooled-sum accumulator (VMEM scratch)
    """
    h = pl.program_id(1)
    bt, hw_t, kp = p_ref.shape
    cfp = wc_ref.shape[1]

    @pl.when(h == 0)
    def _():
        acc_ref[...] = jnp.zeros_like(acc_ref)

    # Conv stage for this HW tile: one big bf16 MXU matmul (M = Bt*hw_tile),
    # f32 accumulation.  Zero-padded K lanes / phantom HW rows contribute 0.
    p2 = p_ref[...].reshape(bt * hw_t, kp)
    conv = jnp.dot(p2, wc_ref[...], preferred_element_type=jnp.float32)
    conv = jnp.maximum(conv, 0.0)

    # Global-average-pool: per-batch-row partial column sums across HW tiles.
    acc_ref[...] += jnp.sum(conv.reshape(bt, hw_t, cfp), axis=1)

    @pl.when(h == pl.num_programs(1) - 1)
    def _():
        pooled = acc_ref[...] * inv_hw                       # divide by REAL HW
        o_ref[...] = (
            jnp.dot(pooled, wf_ref[...], preferred_element_type=jnp.float32)
            + b_ref[...]
        )


# ------------------------------ wrappers -------------------------------------


def im2col_3x3_same(x_nhwc):
    """3x3, stride 1, SAME padding im2col -> [B, H*W, C_in*9] (input dtype kept)."""
    B, H, W, C = x_nhwc.shape
    xp = jnp.pad(x_nhwc, ((0, 0), (1, 1), (1, 1), (0, 0)))
    patches = []
    for di in range(3):
        for dj in range(3):
            patches.append(xp[:, di:di + H, dj:dj + W, :])
    p = jnp.concatenate(patches, axis=-1)          # [B, H, W, C*9]
    return p.reshape(B, H * W, C * 9)


def encoder_cnn_forward(images_nchw, w_conv, w_fc, b_fc, *, hw_tile=None,
                        batch_tile=8):
    """Conv+ReLU stand-in backbone -> global average pool -> replaced fc head."""
    B, C_in, H, W = images_nchw.shape
    HW = H * W
    K, Cf = w_conv.shape
    E = w_fc.shape[1]

    # TPU-friendly padded sizes (zero padding keeps the math identical).
    K_pad = _round_up(K, 16)                                   # bf16 sublane pack
    Cf_pad = _round_up(Cf, 256) if Cf >= 128 else _round_up(Cf, 128)
    E_pad = _round_up(E, 128)
    Bt = batch_tile                                            # 8-row batch blocks
    B_pad = _round_up(B, Bt)

    # bf16 BEFORE the 9-slice im2col: halves the dominant HBM patch stream.
    x_nhwc = jnp.transpose(images_nchw, (0, 2, 3, 1)).astype(jnp.bfloat16)
    patches = im2col_3x3_same(x_nhwc)                          # [B, HW, K] bf16

    # ---- VMEM-aware tiling (v7x has 64 MiB, v5e/v6e 128 MiB) ----------------
    try:
        vmem_cap = int(pltpu.get_tpu_info().vmem_capacity_bytes)
    except Exception:                                          # conservative (v7x)
        vmem_cap = 64 * 1024 * 1024
    vmem_budget = (vmem_cap * 3) // 4                          # leave headroom

    def vmem_use(t):
        return (2 * Bt * t * K_pad * 2                         # patches, 2 bufs, bf16
                + K_pad * Cf_pad * 2                           # conv weight (1 buf)
                + Cf_pad * E_pad * 4 + E_pad * 4               # fc weight + bias
                + Bt * Cf_pad * 4                              # pooled accumulator
                + 2 * Bt * E_pad * 4)                          # output, 2 bufs

    if hw_tile is None:
        hw_tile = 8
        for t in (_round_up(HW, 8), 4096, 2048, 1024, 512, 256, 128, 64, 32, 16, 8):
            if t <= _round_up(HW, 8) and vmem_use(t) <= vmem_budget:
                hw_tile = t
                break
    assert hw_tile % 8 == 0
    HW_pad = _round_up(HW, hw_tile)    # zero HW rows are inert (ReLU(0)=0)
    n_hw = HW_pad // hw_tile

    patches = jnp.pad(
        patches, ((0, B_pad - B), (0, HW_pad - HW), (0, K_pad - K)))
    wc = jnp.pad(w_conv, ((0, K_pad - K), (0, Cf_pad - Cf))).astype(jnp.bfloat16)
    wf = jnp.pad(w_fc, ((0, Cf_pad - Cf), (0, E_pad - E))).astype(jnp.float32)
    bf = jnp.pad(b_fc, ((0, 0), (0, E_pad - E))).astype(jnp.float32)

    kernel = functools.partial(fused_encoder_kernel, inv_hw=1.0 / HW)

    cost = pl.CostEstimate(
        flops=2 * B_pad * HW_pad * K_pad * Cf_pad + 2 * B_pad * Cf_pad * E_pad,
        transcendentals=0,
        bytes_accessed=(B_pad * HW_pad * K_pad * 2 + K_pad * Cf_pad * 2
                        + Cf_pad * E_pad * 4 + E_pad * 4 + B_pad * E_pad * 4),
    )

    def run(single_buffer_consts):
        if single_buffer_consts:
            # constant index_map -> fetched once; 1 buffer halves weight VMEM
            def cspec(shape):
                return pl.BlockSpec(shape, lambda b, h: (0, 0),
                                    pipeline_mode=pl.Buffered(1))
        else:
            def cspec(shape):
                return pl.BlockSpec(shape, lambda b, h: (0, 0))

        return pl.pallas_call(
            kernel,
            out_shape=jax.ShapeDtypeStruct((B_pad, E_pad), jnp.float32),
            grid_spec=pltpu.PrefetchScalarGridSpec(
                num_scalar_prefetch=0,
                grid=(B_pad // Bt, n_hw),
                in_specs=[
                    pl.BlockSpec((Bt, hw_tile, K_pad), lambda b, h: (b, h, 0)),
                    cspec((K_pad, Cf_pad)),
                    cspec((Cf_pad, E_pad)),
                    cspec((1, E_pad)),
                ],
                out_specs=pl.BlockSpec((Bt, E_pad), lambda b, h: (b, 0)),
                scratch_shapes=[pltpu.VMEM((Bt, Cf_pad), jnp.float32)],
            ),
            compiler_params=pltpu.CompilerParams(
                dimension_semantics=("parallel", "arbitrary"),
                vmem_limit_bytes=int(vmem_budget),
            ),
            cost_estimate=cost,
        )(patches, wc, wf, bf)

    try:
        out_pad = run(True)
    except Exception:
        # Fallback if single-buffered constant operands are rejected by the
        # pipeline lowering; semantics are identical, just 2x weight VMEM.
        out_pad = run(False)

    return out_pad[:B, :E]


# ------------------------------- main ----------------------------------------


if __name__ == "__main__":
    B, C_in, H, W = 2, 3, 16, 16     # small NCHW images (inception takes 3ch)
    Cf = 32                          # stand-in for inception's 2048-d features
    embed_size = 16

    key = jax.random.PRNGKey(0)
    k_img, k_conv, k_fc = jax.random.split(key, 3)

    images = jax.random.normal(k_img, (B, C_in, H, W), dtype=jnp.float32)

    # deterministic stand-in conv weight
    w_conv = 0.1 * jax.random.normal(k_conv, (C_in * 9, Cf), dtype=jnp.float32)

    # replaced fc head: xavier_uniform_ weight, constant_(bias, 0)
    bound = math.sqrt(6.0 / (Cf + embed_size))
    w_fc = jax.random.uniform(
        k_fc, (Cf, embed_size), dtype=jnp.float32, minval=-bound, maxval=bound
    )
    b_fc = jnp.zeros((1, embed_size), dtype=jnp.float32)

    # hw_tile=96 forces BOTH the HW zero-padding path (256 -> 288 rows) and a
    # multi-step accumulator at toy scale; real sizes use the auto-derived tile.
    out = encoder_cnn_forward(images, w_conv, w_fc, b_fc, hw_tile=96)
    out = jax.block_until_ready(out)

    # pure-JAX reference (same bf16 rounding of conv inputs, f32 math)
    x_nhwc = jnp.transpose(images, (0, 2, 3, 1)).astype(jnp.bfloat16)
    p_bf = im2col_3x3_same(x_nhwc).astype(jnp.float32)
    wc_bf = w_conv.astype(jnp.bfloat16).astype(jnp.float32)
    ref_feat = jnp.maximum(
        jnp.einsum("bpk,kc->bpc", p_bf, wc_bf,
                   precision=jax.lax.Precision.HIGHEST),
        0.0,
    )
    ref = (
        jnp.dot(jnp.mean(ref_feat, axis=1), w_fc,
                precision=jax.lax.Precision.HIGHEST)
        + b_fc
    )

    assert out.shape == (B, embed_size)
    assert jnp.allclose(out, ref, atol=2e-3, rtol=2e-3), (
        float(jnp.max(jnp.abs(out - ref)))
    )

    print("KERNEL_OK")
</pallas_src>

<mosaic_0001>
module attributes {stable_mosaic.version = 11 : i64} {
  func.func @fused_encoder_kernel(%arg0: i32, %arg1: i32, %arg2: memref<8x96x32xbf16, #tpu.memory_space<vmem>>, %arg3: memref<32x128xbf16, #tpu.memory_space<vmem>>, %arg4: memref<128x128xf32, #tpu.memory_space<vmem>>, %arg5: memref<1x128xf32, #tpu.memory_space<vmem>>, %arg6: memref<8x128xf32, #tpu.memory_space<vmem>>, %arg7: memref<8x128xf32, #tpu.memory_space<vmem>>) attributes {dimension_semantics = [#tpu.dimension_semantics<parallel>, #tpu.dimension_semantics<arbitrary>], iteration_bounds = array<i64: 1, 3>, scalar_prefetch = 0 : i64, scratch_operands = 1 : i64, tpu.core_type = #tpu.core_type<tc>, window_params = [{transform_indices = @transform_0, window_bounds = array<i64: 8, 96, 32>}, {pipeline_mode = #tpu.pipeline_mode<synchronous>, transform_indices = @transform_1, window_bounds = array<i64: 32, 128>}, {pipeline_mode = #tpu.pipeline_mode<synchronous>, transform_indices = @transform_2, window_bounds = array<i64: 128, 128>}, {pipeline_mode = #tpu.pipeline_mode<synchronous>, transform_indices = @transform_3, window_bounds = array<i64: 1, 128>}, {transform_indices = @transform_4, window_bounds = array<i64: 8, 128>}]} {
    %c0_i32 = arith.constant 0 : i32
    %0 = arith.cmpi eq, %arg1, %c0_i32 : i32
    %1 = arith.extui %0 : i1 to i32
    %c0_i32_0 = arith.constant 0 : i32
    %2 = arith.cmpi ne, %1, %c0_i32_0 : i32
    scf.if %2 {
      %cst_12 = arith.constant 0.000000e+00 : f32
      %17 = vector.broadcast %cst_12 : f32 to vector<8x128xf32>
      %c0_13 = arith.constant 0 : index
      %c0_14 = arith.constant 0 : index
      %18 = vector.load %arg7[%c0_13, %c0_14] : memref<8x128xf32, #tpu.memory_space<vmem>>, vector<8x128xf32>
      tpu.vector_store %arg7[%c0_13, %c0_14], %17 {strides = array<i32>} : memref<8x128xf32, #tpu.memory_space<vmem>>, vector<8x128xf32>,
    } else {
    }
    %c0 = arith.constant 0 : index
    %c0_1 = arith.constant 0 : index
    %c0_2 = arith.constant 0 : index
    %3 = vector.load %arg2[%c0, %c0_1, %c0_2] : memref<8x96x32xbf16, #tpu.memory_space<vmem>>, vector<8x96x32xbf16>
    %4 = vector.shape_cast %3 : vector<8x96x32xbf16> to vector<768x32xbf16>
    %c0_3 = arith.constant 0 : index
    %c0_4 = arith.constant 0 : index
    %5 = vector.load %arg3[%c0_3, %c0_4] : memref<32x128xbf16, #tpu.memory_space<vmem>>, vector<32x128xbf16>
    %cst = arith.constant dense<0.000000e+00> : vector<768x128xf32>
    %6 = tpu.matmul %4, %5, %cst {dimension_numbers = #tpu.dot_dimension_numbers<[1], [0], [0], [1], [0, 0, 1, 1], [], []>} : vector<768x32xbf16>, vector<32x128xbf16>, vector<768x128xf32> -> vector<768x128xf32>
    %cst_5 = arith.constant 0.000000e+00 : f32
    %7 = vector.broadcast %cst_5 : f32 to vector<768x128xf32>
    %8 = arith.maximumf %6, %7 : vector<768x128xf32>
    %c0_6 = arith.constant 0 : index
    %c0_7 = arith.constant 0 : index
    %9 = vector.load %arg7[%c0_6, %c0_7] : memref<8x128xf32, #tpu.memory_space<vmem>>, vector<8x128xf32>
    %10 = vector.shape_cast %8 : vector<768x128xf32> to vector<8x96x128xf32>
    %cst_8 = arith.constant dense<0.000000e+00> : vector<8x128xf32>
    %11 = vector.multi_reduction <add>, %10, %cst_8 [1] : vector<8x96x128xf32> to vector<8x128xf32>
    %12 = arith.addf %9, %11 : vector<8x128xf32>
    %c0_9 = arith.constant 0 : index
    %c0_10 = arith.constant 0 : index
    %13 = vector.load %arg7[%c0_9, %c0_10] : memref<8x128xf32, #tpu.memory_space<vmem>>, vector<8x128xf32>
    tpu.vector_store %arg7[%c0_9, %c0_10], %12 {strides = array<i32>} : memref<8x128xf32, #tpu.memory_space<vmem>>, vector<8x128xf32>,
    %c2_i32 = arith.constant 2 : i32
    %14 = arith.cmpi eq, %arg1, %c2_i32 : i32
    %15 = arith.extui %14 : i1 to i32
    %c0_i32_11 = arith.constant 0 : i32
    %16 = arith.cmpi ne, %15, %c0_i32_11 : i32
    scf.if %16 {
      %c0_12 = arith.constant 0 : index
      %c0_13 = arith.constant 0 : index
      %17 = vector.load %arg7[%c0_12, %c0_13] : memref<8x128xf32, #tpu.memory_space<vmem>>, vector<8x128xf32>
      %cst_14 = arith.constant 3.906250e-03 : f32
      %18 = vector.broadcast %cst_14 : f32 to vector<8x128xf32>
      %19 = arith.mulf %17, %18 : vector<8x128xf32>
      %c0_15 = arith.constant 0 : index
      %c0_16 = arith.constant 0 : index
      %20 = vector.load %arg4[%c0_15, %c0_16] : memref<128x128xf32, #tpu.memory_space<vmem>>, vector<128x128xf32>
      %cst_17 = arith.constant dense<0.000000e+00> : vector<8x128xf32>
      %21 = tpu.matmul %19, %20, %cst_17 {dimension_numbers = #tpu.dot_dimension_numbers<[1], [0], [0], [1], [0, 0, 1, 1], [], []>} : vector<8x128xf32>, vector<128x128xf32>, vector<8x128xf32> -> vector<8x128xf32>
      %c0_18 = arith.constant 0 : index
      %c0_19 = arith.constant 0 : index
      %22 = vector.load %arg5[%c0_18, %c0_19] : memref<1x128xf32, #tpu.memory_space<vmem>>, vector<1x128xf32>
      %23 = vector.broadcast %22 : vector<1x128xf32> to vector<8x128xf32>
      %24 = arith.addf %21, %23 : vector<8x128xf32>
      %c0_20 = arith.constant 0 : index
      %c0_21 = arith.constant 0 : index
      %25 = vector.load %arg6[%c0_20, %c0_21] : memref<8x128xf32, #tpu.memory_space<vmem>>, vector<8x128xf32>
      tpu.vector_store %arg6[%c0_20, %c0_21], %24 {strides = array<i32>} : memref<8x128xf32, #tpu.memory_space<vmem>>, vector<8x128xf32>,
    } else {
    }
    return
  }
  func.func @transform_0(%arg0: i32, %arg1: i32) -> (i32, i32, i32) {
    %c0_i32 = arith.constant 0 : i32
    %c0_i32_0 = arith.constant 0 : i32
    return %arg0, %arg1, %c0_i32 : i32, i32, i32
  }
  func.func @transform_1(%arg0: i32, %arg1: i32) -> (i32, i32) {
    %c0_i32 = arith.constant 0 : i32
    %c0_i32_0 = arith.constant 0 : i32
    %c0_i32_1 = arith.constant 0 : i32
    return %c0_i32, %c0_i32_0 : i32, i32
  }
  func.func @transform_2(%arg0: i32, %arg1: i32) -> (i32, i32) {
    %c0_i32 = arith.constant 0 : i32
    %c0_i32_0 = arith.constant 0 : i32
    %c0_i32_1 = arith.constant 0 : i32
    return %c0_i32, %c0_i32_0 : i32, i32
  }
  func.func @transform_3(%arg0: i32, %arg1: i32) -> (i32, i32) {
    %c0_i32 = arith.constant 0 : i32
    %c0_i32_0 = arith.constant 0 : i32
    %c0_i32_1 = arith.constant 0 : i32
    return %c0_i32, %c0_i32_0 : i32, i32
  }
  func.func @transform_4(%arg0: i32, %arg1: i32) -> (i32, i32) {
    %c0_i32 = arith.constant 0 : i32
    %c0_i32_0 = arith.constant 0 : i32
    return %arg0, %c0_i32 : i32, i32
  }
}

module attributes {stable_mosaic.version = 11 : i64} {
  func.func @fused_encoder_kernel(%arg0: i32, %arg1: i32, %arg2: memref<8x96x32xbf16, #tpu.memory_space<vmem>>, %arg3: memref<32x128xbf16, #tpu.memory_space<vmem>>, %arg4: memref<128x128xf32, #tpu.memory_space<vmem>>, %arg5: memref<1x128xf32, #tpu.memory_space<vmem>>, %arg6: memref<8x128xf32, #tpu.memory_space<vmem>>, %arg7: memref<8x128xf32, #tpu.memory_space<vmem>>) attributes {dimension_semantics = [#tpu.dimension_semantics<parallel>, #tpu.dimension_semantics<arbitrary>], iteration_bounds = array<i64: 1, 3>, scalar_prefetch = 0 : i64, scratch_operands = 1 : i64, tpu.core_type = #tpu.core_type<tc>, window_params = [{transform_indices = @transform_0, window_bounds = array<i64: 8, 96, 32>}, {pipeline_mode = #tpu.pipeline_mode<synchronous>, transform_indices = @transform_1, window_bounds = array<i64: 32, 128>}, {pipeline_mode = #tpu.pipeline_mode<synchronous>, transform_indices = @transform_2, window_bounds = array<i64: 128, 128>}, {pipeline_mode = #tpu.pipeline_mode<synchronous>, transform_indices = @transform_3, window_bounds = array<i64: 1, 128>}, {transform_indices = @transform_4, window_bounds = array<i64: 8, 128>}]} {
    %c0_i32 = arith.constant 0 : i32
    %0 = arith.cmpi eq, %arg1, %c0_i32 : i32
    %1 = arith.extui %0 : i1 to i32
    %c0_i32_0 = arith.constant 0 : i32
    %2 = arith.cmpi ne, %1, %c0_i32_0 : i32
    scf.if %2 {
      %cst_12 = arith.constant 0.000000e+00 : f32
      %17 = vector.broadcast %cst_12 : f32 to vector<8x128xf32>
      %c0_13 = arith.constant 0 : index
      %c0_14 = arith.constant 0 : index
      %18 = vector.load %arg7[%c0_13, %c0_14] : memref<8x128xf32, #tpu.memory_space<vmem>>, vector<8x128xf32>
      tpu.vector_store %arg7[%c0_13, %c0_14], %17 {strides = array<i32>} : memref<8x128xf32, #tpu.memory_space<vmem>>, vector<8x128xf32>,
    } else {
    }
    %c0 = arith.constant 0 : index
    %c0_1 = arith.constant 0 : index
    %c0_2 = arith.constant 0 : index
    %3 = vector.load %arg2[%c0, %c0_1, %c0_2] : memref<8x96x32xbf16, #tpu.memory_space<vmem>>, vector<8x96x32xbf16>
    %4 = vector.shape_cast %3 : vector<8x96x32xbf16> to vector<768x32xbf16>
    %c0_3 = arith.constant 0 : index
    %c0_4 = arith.constant 0 : index
    %5 = vector.load %arg3[%c0_3, %c0_4] : memref<32x128xbf16, #tpu.memory_space<vmem>>, vector<32x128xbf16>
    %cst = arith.constant dense<0.000000e+00> : vector<768x128xf32>
    %6 = tpu.matmul %4, %5, %cst {dimension_numbers = #tpu.dot_dimension_numbers<[1], [0], [0], [1], [0, 0, 1, 1], [], []>} : vector<768x32xbf16>, vector<32x128xbf16>, vector<768x128xf32> -> vector<768x128xf32>
    %cst_5 = arith.constant 0.000000e+00 : f32
    %7 = vector.broadcast %cst_5 : f32 to vector<768x128xf32>
    %8 = arith.maximumf %6, %7 : vector<768x128xf32>
    %c0_6 = arith.constant 0 : index
    %c0_7 = arith.constant 0 : index
    %9 = vector.load %arg7[%c0_6, %c0_7] : memref<8x128xf32, #tpu.memory_space<vmem>>, vector<8x128xf32>
    %10 = vector.shape_cast %8 : vector<768x128xf32> to vector<8x96x128xf32>
    %cst_8 = arith.constant dense<0.000000e+00> : vector<8x128xf32>
    %11 = vector.multi_reduction <add>, %10, %cst_8 [1] : vector<8x96x128xf32> to vector<8x128xf32>
    %12 = arith.addf %9, %11 : vector<8x128xf32>
    %c0_9 = arith.constant 0 : index
    %c0_10 = arith.constant 0 : index
    %13 = vector.load %arg7[%c0_9, %c0_10] : memref<8x128xf32, #tpu.memory_space<vmem>>, vector<8x128xf32>
    tpu.vector_store %arg7[%c0_9, %c0_10], %12 {strides = array<i32>} : memref<8x128xf32, #tpu.memory_space<vmem>>, vector<8x128xf32>,
    %c2_i32 = arith.constant 2 : i32
    %14 = arith.cmpi eq, %arg1, %c2_i32 : i32
    %15 = arith.extui %14 : i1 to i32
    %c0_i32_11 = arith.constant 0 : i32
    %16 = arith.cmpi ne, %15, %c0_i32_11 : i32
    scf.if %16 {
      %c0_12 = arith.constant 0 : index
      %c0_13 = arith.constant 0 : index
      %17 = vector.load %arg7[%c0_12, %c0_13] : memref<8x128xf32, #tpu.memory_space<vmem>>, vector<8x128xf32>
      %cst_14 = arith.constant 3.906250e-03 : f32
      %18 = vector.broadcast %cst_14 : f32 to vector<8x128xf32>
      %19 = arith.mulf %17, %18 : vector<8x128xf32>
      %c0_15 = arith.constant 0 : index
      %c0_16 = arith.constant 0 : index
      %20 = vector.load %arg4[%c0_15, %c0_16] : memref<128x128xf32, #tpu.memory_space<vmem>>, vector<128x128xf32>
      %cst_17 = arith.constant dense<0.000000e+00> : vector<8x128xf32>
      %21 = tpu.matmul %19, %20, %cst_17 {dimension_numbers = #tpu.dot_dimension_numbers<[1], [0], [0], [1], [0, 0, 1, 1], [], []>} : vector<8x128xf32>, vector<128x128xf32>, vector<8x128xf32> -> vector<8x128xf32>
      %c0_18 = arith.constant 0 : index
      %c0_19 = arith.constant 0 : index
      %22 = vector.load %arg5[%c0_18, %c0_19] : memref<1x128xf32, #tpu.memory_space<vmem>>, vector<1x128xf32>
      %23 = vector.broadcast %22 : vector<1x128xf32> to vector<8x128xf32>
      %24 = arith.addf %21, %23 : vector<8x128xf32>
      %c0_20 = arith.constant 0 : index
      %c0_21 = arith.constant 0 : index
      %25 = vector.load %arg6[%c0_20, %c0_21] : memref<8x128xf32, #tpu.memory_space<vmem>>, vector<8x128xf32>
      tpu.vector_store %arg6[%c0_20, %c0_21], %24 {strides = array<i32>} : memref<8x128xf32, #tpu.memory_space<vmem>>, vector<8x128xf32>,
    } else {
    }
    return
  }
  func.func @transform_0(%arg0: i32, %arg1: i32) -> (i32, i32, i32) {
    %c0_i32 = arith.constant 0 : i32
    %c0_i32_0 = arith.constant 0 : i32
    return %arg0, %arg1, %c0_i32 : i32, i32, i32
  }
  func.func @transform_1(%arg0: i32, %arg1: i32) -> (i32, i32) {
    %c0_i32 = arith.constant 0 : i32
    %c0_i32_0 = arith.constant 0 : i32
    %c0_i32_1 = arith.constant 0 : i32
    return %c0_i32, %c0_i32_0 : i32, i32
  }
  func.func @transform_2(%arg0: i32, %arg1: i32) -> (i32, i32) {
    %c0_i32 = arith.constant 0 : i32
    %c0_i32_0 = arith.constant 0 : i32
    %c0_i32_1 = arith.constant 0 : i32
    return %c0_i32, %c0_i32_0 : i32, i32
  }
  func.func @transform_3(%arg0: i32, %arg1: i32) -> (i32, i32) {
    %c0_i32 = arith.constant 0 : i32
    %c0_i32_0 = arith.constant 0 : i32
    %c0_i32_1 = arith.constant 0 : i32
    return %c0_i32, %c0_i32_0 : i32, i32
  }
  func.func @transform_4(%arg0: i32, %arg1: i32) -> (i32, i32) {
    %c0_i32 = arith.constant 0 : i32
    %c0_i32_0 = arith.constant 0 : i32
    return %arg0, %c0_i32 : i32, i32
  }
}

</mosaic_0001>

<bundles_post_ra>
// kernel: tpu_custom_call.1
= control target key start
LH: loop header
LB: loop body
LE: loop exit
PB: predicated region body
PF: predicated region fallthrough
CT: control target
= control target key end

     0   :  { %9 = vsyncpa [#allocation5], 0  ;;  %s2494_s15 = smov 0   ;;  %s2496_s16 = smov 0   ;;  %s2892_s0 = inlined_call_operand.vmem [shape: bf16[8,288,32], index: 0, kind: input, shape index: {}]   ;;  %s2893_s1 = inlined_call_operand.vmem [shape: bf16[32,128], index: 1, kind: input, shape index: {}]   ;;  %s2894_s2 = inlined_call_operand.vmem [shape: f32[128,128], index: 2, kind: input, shape index: {}]   ;;  %s2895_s3 = inlined_call_operand.vmem [shape: f32[1,128], index: 3, kind: input, shape index: {}]   ;;  %s2896_s4 = inlined_call_operand.hbm [shape: f32[8,128], index: 4, kind: output, shape index: {}]  }
   0x1   :  { %s2498_s17 = smov 0   ;;  %s2500_s18 = smov 0  }
   0x2   :  { %s2502_s19 = smov 0  }
   0x3 LB: > { %s1978_s20 = sadd.s32 4294967295, %s2463_s19   ;;  %s24_s21 = sadd.s32 1, %s2459_s18  ;;  %s2463_s19 = sphi %s2502_s19, %s15_s19   ;;  %s2459_s18 = sphi %s2500_s18, %s2901_s18   ;;  %s2455_s17 = sphi %s2498_s17, %s2900_s17   ;;  %s2451_s16 = sphi %s2496_s16, %s2899_s16   ;;  %s2447_s15 = sphi %s2494_s15, %s2898_s15  }
   0x4   : > { %p25_p0 = scmp.ge.s32.totalorder %s24_s21, 3  ;;  %p43_p1 = scmp.ne.s32.totalorder %s2451_s16, %s2447_s15 }
   0x5   : > { %p44_p2 = scmp.eq.s32.totalorder %s2463_s19, 0  ;;  %s36_s23 = sadd.s32 1, %s2451_s16 }
   0x6   : > { %s2903_s21 = smov (%p25_p0, %s24_s21), 0  ;;  %p1980_p5 = scmp.ge.s32.totalorder %s2463_s19, 3 }
   0x7   : > { %p45_p3 = por %p44_p2, %p43_p1  ;;  %s32_s22 = ssub.s32 %s2459_s18, %s2903_s21 }
   0x8   : > { %p34_p4 = scmp.eq.s32.totalorder %s32_s22, 0  ;;  %167 = sbr.rel (%p1980_p5) target bundleno = 42 (0x2a), region = 28 }
   0xa   : > { %s2530_s24 = scalar_select %p34_p4, %s2451_s16, %s36_s23  }
   0xd   : > { %170 = sbr.rel (!%p45_p3) target bundleno = 42 (0x2a), region = 32  ;;  %s172_s25 = sand.u32 (%p45_p3), 1, %s2451_s16  }
   0xe   : > { %s2088_s26 = smul.u32 (%p45_p3), 48, %s2459_s18 }
   0xf   : > { %s2295_s27 = smul.u32 (%p45_p3), 384, %s172_s25 }
  0x10   : > { %s2538_s30 = scalar_lea.vmem (%p45_p3), %s2892_s0, %s2088_s26 }
  0x11   : > { %v197_v0 = vld [vmem:[%s2538_s30] sm:$0xff] (%p45_p3)   ;;  %v201_v1 = vld [vmem:[%s2538_s30 + $0x8] sm:$0xff] (%p45_p3)   ;;  %v205_v2 = vld [vmem:[%s2538_s30 + $0x10] sm:$0xff] (%p45_p3)   ;;  %s2543_s5 = scalar_lea.vmem (%p45_p3), [#allocation3], %s2295_s27 }
  0x12   : > { %198 = vst [vmem:[%s2543_s5] sm:$0xff] %v197_v0   ;;  %202 = vst [vmem:[%s2543_s5 + $0x8] sm:$0xff] %v201_v1   ;;  %v209_v3 = vld [vmem:[%s2538_s30 + $0x18] sm:$0xff]   ;;  %v213_v4 = vld [vmem:[%s2538_s30 + $0x20] sm:$0xff]  }
  0x13   : > { %206 = vst [vmem:[%s2543_s5 + $0x10] sm:$0xff] %v205_v2   ;;  %v217_v5 = vld [vmem:[%s2538_s30 + $0x28] sm:$0xff]   ;;  %210 = vst [vmem:[%s2543_s5 + $0x18] sm:$0xff] %v209_v3   ;;  %v221_v6 = vld [vmem:[%s2538_s30 + $0x90] sm:$0xff]  }
  0x14   : > { %214 = vst [vmem:[%s2543_s5 + $0x20] sm:$0xff] %v213_v4   ;;  %218 = vst [vmem:[%s2543_s5 + $0x28] sm:$0xff] %v217_v5   ;;  %v225_v7 = vld [vmem:[%s2538_s30 + $0x98] sm:$0xff]   ;;  %v229_v8 = vld [vmem:[%s2538_s30 + $0xa0] sm:$0xff]  }
  0x15   : > { %222 = vst [vmem:[%s2543_s5 + $0x30] sm:$0xff] %v221_v6   ;;  %226 = vst [vmem:[%s2543_s5 + $0x38] sm:$0xff] %v225_v7   ;;  %v233_v9 = vld [vmem:[%s2538_s30 + $0xa8] sm:$0xff]   ;;  %v237_v10 = vld [vmem:[%s2538_s30 + $0xb0] sm:$0xff]  }
  0x16   : > { %230 = vst [vmem:[%s2543_s5 + $0x40] sm:$0xff] %v229_v8   ;;  %v241_v11 = vld [vmem:[%s2538_s30 + $0xb8] sm:$0xff]   ;;  %234 = vst [vmem:[%s2543_s5 + $0x48] sm:$0xff] %v233_v9   ;;  %v245_v12 = vld [vmem:[%s2538_s30 + $0x120] sm:$0xff]  }
  0x17   : > { %238 = vst [vmem:[%s2543_s5 + $0x50] sm:$0xff] %v237_v10   ;;  %242 = vst [vmem:[%s2543_s5 + $0x58] sm:$0xff] %v241_v11   ;;  %v249_v13 = vld [vmem:[%s2538_s30 + $0x128] sm:$0xff]   ;;  %v253_v14 = vld [vmem:[%s2538_s30 + $0x130] sm:$0xff]  }
  0x18   : > { %246 = vst [vmem:[%s2543_s5 + $0x60] sm:$0xff] %v245_v12   ;;  %250 = vst [vmem:[%s2543_s5 + $0x68] sm:$0xff] %v249_v13   ;;  %v257_v15 = vld [vmem:[%s2538_s30 + $0x138] sm:$0xff]   ;;  %v261_v16 = vld [vmem:[%s2538_s30 + $0x140] sm:$0xff]  }
  0x19   : > { %254 = vst [vmem:[%s2543_s5 + $0x70] sm:$0xff] %v253_v14   ;;  %v265_v17 = vld [vmem:[%s2538_s30 + $0x148] sm:$0xff]   ;;  %258 = vst [vmem:[%s2543_s5 + $0x78] sm:$0xff] %v257_v15   ;;  %v269_v18 = vld [vmem:[%s2538_s30 + $0x1b0] sm:$0xff]  }
  0x1a   : > { %262 = vst [vmem:[%s2543_s5 + $0x80] sm:$0xff] %v261_v16   ;;  %266 = vst [vmem:[%s2543_s5 + $0x88] sm:$0xff] %v265_v17   ;;  %v273_v19 = vld [vmem:[%s2538_s30 + $0x1b8] sm:$0xff]   ;;  %v277_v20 = vld [vmem:[%s2538_s30 + $0x1c0] sm:$0xff]  }
  0x1b   : > { %270 = vst [vmem:[%s2543_s5 + $0x90] sm:$0xff] %v269_v18   ;;  %274 = vst [vmem:[%s2543_s5 + $0x98] sm:$0xff] %v273_v19   ;;  %v281_v21 = vld [vmem:[%s2538_s30 + $0x1c8] sm:$0xff]   ;;  %v285_v22 = vld [vmem:[%s2538_s30 + $0x1d0] sm:$0xff]  }
  0x1c   : > { %278 = vst [vmem:[%s2543_s5 + $0xa0] sm:$0xff] %v277_v20   ;;  %v289_v23 = vld [vmem:[%s2538_s30 + $0x1d8] sm:$0xff]   ;;  %282 = vst [vmem:[%s2543_s5 + $0xa8] sm:$0xff] %v281_v21   ;;  %v293_v24 = vld [vmem:[%s2538_s30 + $0x240] sm:$0xff]  }
  0x1d   : > { %286 = vst [vmem:[%s2543_s5 + $0xb0] sm:$0xff] %v285_v22   ;;  %290 = vst [vmem:[%s2543_s5 + $0xb8] sm:$0xff] %v289_v23   ;;  %v297_v25 = vld [vmem:[%s2538_s30 + $0x248] sm:$0xff]   ;;  %v301_v26 = vld [vmem:[%s2538_s30 + $0x250] sm:$0xff]  }
  0x1e   : > { %294 = vst [vmem:[%s2543_s5 + $0xc0] sm:$0xff] %v293_v24   ;;  %298 = vst [vmem:[%s2543_s5 + $0xc8] sm:$0xff] %v297_v25   ;;  %v305_v27 = vld [vmem:[%s2538_s30 + $0x258] sm:$0xff]   ;;  %v309_v28 = vld [vmem:[%s2538_s30 + $0x260] sm:$0xff]  }
  0x1f   : > { %302 = vst [vmem:[%s2543_s5 + $0xd0] sm:$0xff] %v301_v26   ;;  %v313_v29 = vld [vmem:[%s2538_s30 + $0x268] sm:$0xff]   ;;  %306 = vst [vmem:[%s2543_s5 + $0xd8] sm:$0xff] %v305_v27   ;;  %v317_v30 = vld [vmem:[%s2538_s30 + $0x2d0] sm:$0xff]  }
  0x20   : > { %310 = vst [vmem:[%s2543_s5 + $0xe0] sm:$0xff] %v309_v28   ;;  %314 = vst [vmem:[%s2543_s5 + $0xe8] sm:$0xff] %v313_v29   ;;  %v321_v31 = vld [vmem:[%s2538_s30 + $0x2d8] sm:$0xff]   ;;  %v325_v32 = vld [vmem:[%s2538_s30 + $0x2e0] sm:$0xff]  }
  0x21   : > { %318 = vst [vmem:[%s2543_s5 + $0xf0] sm:$0xff] %v317_v30   ;;  %322 = vst [vmem:[%s2543_s5 + $0xf8] sm:$0xff] %v321_v31   ;;  %v329_v33 = vld [vmem:[%s2538_s30 + $0x2e8] sm:$0xff]   ;;  %v333_v34 = vld [vmem:[%s2538_s30 + $0x2f0] sm:$0xff]  }
  0x22   : > { %326 = vst [vmem:[%s2543_s5 + $0x100] sm:$0xff] %v325_v32   ;;  %v337_v35 = vld [vmem:[%s2538_s30 + $0x2f8] sm:$0xff]   ;;  %330 = vst [vmem:[%s2543_s5 + $0x108] sm:$0xff] %v329_v33   ;;  %v341_v36 = vld [vmem:[%s2538_s30 + $0x360] sm:$0xff]  }
  0x23   : > { %334 = vst [vmem:[%s2543_s5 + $0x110] sm:$0xff] %v333_v34   ;;  %338 = vst [vmem:[%s2543_s5 + $0x118] sm:$0xff] %v337_v35   ;;  %v345_v37 = vld [vmem:[%s2538_s30 + $0x368] sm:$0xff]   ;;  %v349_v38 = vld [vmem:[%s2538_s30 + $0x370] sm:$0xff]  }
  0x24   : > { %342 = vst [vmem:[%s2543_s5 + $0x120] sm:$0xff] %v341_v36   ;;  %346 = vst [vmem:[%s2543_s5 + $0x128] sm:$0xff] %v345_v37   ;;  %v353_v39 = vld [vmem:[%s2538_s30 + $0x378] sm:$0xff]   ;;  %v357_v40 = vld [vmem:[%s2538_s30 + $0x380] sm:$0xff]  }
  0x25   : > { %350 = vst [vmem:[%s2543_s5 + $0x130] sm:$0xff] %v349_v38   ;;  %v361_v41 = vld [vmem:[%s2538_s30 + $0x388] sm:$0xff]   ;;  %354 = vst [vmem:[%s2543_s5 + $0x138] sm:$0xff] %v353_v39   ;;  %v365_v42 = vld [vmem:[%s2538_s30 + $0x3f0] sm:$0xff]  }
  0x26   : > { %358 = vst [vmem:[%s2543_s5 + $0x140] sm:$0xff] %v357_v40   ;;  %362 = vst [vmem:[%s2543_s5 + $0x148] sm:$0xff] %v361_v41   ;;  %v369_v43 = vld [vmem:[%s2538_s30 + $0x3f8] sm:$0xff]   ;;  %v373_v44 = vld [vmem:[%s2538_s30 + $0x400] sm:$0xff]  }
  0x27   : > { %366 = vst [vmem:[%s2543_s5 + $0x150] sm:$0xff] %v365_v42   ;;  %370 = vst [vmem:[%s2543_s5 + $0x158] sm:$0xff] %v369_v43   ;;  %v377_v45 = vld [vmem:[%s2538_s30 + $0x408] sm:$0xff]   ;;  %v381_v46 = vld [vmem:[%s2538_s30 + $0x410] sm:$0xff]  }
  0x28   : > { %374 = vst [vmem:[%s2543_s5 + $0x160] sm:$0xff] %v373_v44   ;;  %v385_v47 = vld [vmem:[%s2538_s30 + $0x418] sm:$0xff]   ;;  %378 = vst [vmem:[%s2543_s5 + $0x168] sm:$0xff] %v377_v45  }
  0x29   : > { %382 = vst [vmem:[%s2543_s5 + $0x170] sm:$0xff] %v381_v46   ;;  %386 = vst [vmem:[%s2543_s5 + $0x178] sm:$0xff] %v385_v47  }
  0x2a PF: > { %p1982_p6 = scmp.ge.s32.totalorder %s2463_s19, 1  ;;  %p603_p7 = scmp.lt.s32.totalorder %s2463_s19, 4 }
  0x2c   : > { %p604_p8 = pnand %p1982_p6, %p603_p7 }
  0x2d   : > { %s610_s6 = sand.u32 (!%p604_p8), 1, %s2447_s15   ;;  %p1983_p9 = scmp.ne.s32.totalorder (!%p604_p8), %s2455_s17, 0 }
  0x2e   : > { %607 = sbr.rel (%p604_p8) target bundleno = 626 (0x272), region = 73 }
  0x2f   : > { %s2296_s7 = smul.u32 (!%p604_p8), 384, %s610_s6 }
  0x31   : > { %s2641_s8 = scalar_lea.vmem (!%p604_p8), [#allocation3], %s2296_s7 }
  0x33   : > { %636 = sbr.rel (%p1983_p9) target bundleno = 58 (0x3a), region = 81 }
  0x38   : > { %v2465_v48 = vmov 0.0  }
  0x39   : > { %637 = vst [vmem:[#allocation2] sm:$0xff] %v2465_v48 }
  0x3a PF: > { %v2347_v49 = vld [vmem:[%s2893_s1 + $0x8] sm:$0xff]   ;;  %v2348_v50 = vld [vmem:[%s2893_s1] sm:$0xff]   ;;  %vm990_vm0 = vcmask 261120   ;;  %v2351_v53 = vld [vmem:[%s2641_s8 + $0x8] sm:$0xff]   ;;  %vm1793_vm1 = vcmask 1041409   ;;  %vm1795_vm2 = vcmask 1042434  }
  0x3b   : > { %2156 = vmatprep.subr.bf16.mxu0 %v2347_v49  ;;  %2291 = vmatprep.subr.bf16.mxu1 %v2347_v49  ;;  %v2349_v51 = vld [vmem:[%s2641_s8] sm:$0xff]   ;;  %v2352_v54 = vld [vmem:[%s2641_s8 + $0xc8] sm:$0xff]   ;;  %v2353_v55 = vld [vmem:[%s2641_s8 + $0x10] sm:$0xff]   ;;  %vm1797_vm3 = vcmask 1043459   ;;  %vm1799_vm4 = vcmask 1044484   ;;  %vm1801_vm5 = vcmask 1045509  }
  0x3c   : > { %2157 = vmatpush3.bf16.msra.mxu0 %v2347_v49  ;;  %2293 = vmatpush3.bf16.msra.mxu1 %v2347_v49  ;;  %v2350_v52 = vld [vmem:[%s2641_s8 + $0xc0] sm:$0xff]   ;;  %v2354_v56 = vld [vmem:[%s2641_s8 + $0xd0] sm:$0xff]   ;;  %v2355_v57 = vld [vmem:[%s2641_s8 + $0x18] sm:$0xff]   ;;  %vm1803_vm6 = vcmask 1046534   ;;  %vm1805_vm7 = vcmask 1047559   ;;  %p2082_p10 = scmp.ne.s32.totalorder %s2455_s17, 2 }
  0x3d   : > { %2158 = vmatprep.subr.bf16.mxu0 %v2348_v50  ;;  %2292 = vmatprep.subr.bf16.mxu1 %v2348_v50  ;;  %v2356_v58 = vld [vmem:[%s2641_s8 + $0xd8] sm:$0xff]   ;;  %v2357_v59 = vld [vmem:[%s2641_s8 + $0x20] sm:$0xff]   ;;  %v2359_v61 = vld [vmem:[%s2641_s8 + $0x28] sm:$0xff]  }
  0x3e   : > { %2160 = vmatprep.mubr.msk.bf16.mxu0 %vm990_vm0, %v2349_v51  ;;  %2208 = vmatprep.mubr.msk.bf16.mxu1 %vm990_vm0, %v2350_v52  ;;  %v2358_v60 = vld [vmem:[%s2641_s8 + $0xe0] sm:$0xff]   ;;  %v2360_v62 = vld [vmem:[%s2641_s8 + $0xe8] sm:$0xff]   ;;  %v2361_v63 = vld [vmem:[%s2641_s8 + $0x30] sm:$0xff]  }
  0x3f   : > { %v2362_v0 = vld [vmem:[%s2641_s8 + $0xf0] sm:$0xff]   ;;  %v2363_v1 = vld [vmem:[%s2641_s8 + $0x38] sm:$0xff]   ;;  %v2365_v3 = vld [vmem:[%s2641_s8 + $0x40] sm:$0xff]  }
  0x40   : > { %2159 = vmatpush3.bf16.msra.mxu0 %v2348_v50  ;;  %2294 = vmatpush3.bf16.msra.mxu1 %v2348_v50  ;;  %v2364_v2 = vld [vmem:[%s2641_s8 + $0xf8] sm:$0xff]   ;;  %v2366_v4 = vld [vmem:[%s2641_s8 + $0x100] sm:$0xff]   ;;  %v2367_v5 = vld [vmem:[%s2641_s8 + $0x48] sm:$0xff]  }
  0x41   : > { %v2368_v6 = vld [vmem:[%s2641_s8 + $0x108] sm:$0xff]   ;;  %v2369_v7 = vld [vmem:[%s2641_s8 + $0x50] sm:$0xff]   ;;  %v2371_v9 = vld [vmem:[%s2641_s8 + $0x58] sm:$0xff]  }
  0x42   : > { %v2370_v8 = vld [vmem:[%s2641_s8 + $0x110] sm:$0xff]   ;;  %v2372_v10 = vld [vmem:[%s2641_s8 + $0x118] sm:$0xff]   ;;  %v2373_v11 = vld [vmem:[%s2641_s8 + $0x60] sm:$0xff]  }
  0x43   : > { %2161 = vmatmul.mubr.msk.bf16.vlgmr.msra.gmra.mxu0 %vm990_vm0, %v2351_v53  ;;  %2209 = vmatmul.mubr.msk.bf16.vlgmr.msra.gmra.mxu1 %vm990_vm0, %v2352_v54  ;;  %v2374_v12 = vld [vmem:[%s2641_s8 + $0x120] sm:$0xff]   ;;  %v2375_v13 = vld [vmem:[%s2641_s8 + $0x68] sm:$0xff]   ;;  %v2377_v15 = vld [vmem:[%s2641_s8 + $0x70] sm:$0xff]  }
  0x44   : > { %2164 = vmatprep.mubr.msk.bf16.mxu0 %vm990_vm0, %v2353_v55  ;;  %2212 = vmatprep.mubr.msk.bf16.mxu1 %vm990_vm0, %v2354_v56  ;;  %v2376_v14 = vld [vmem:[%s2641_s8 + $0x128] sm:$0xff]   ;;  %v2378_v16 = vld [vmem:[%s2641_s8 + $0x130] sm:$0xff]   ;;  %v2379_v17 = vld [vmem:[%s2641_s8 + $0x78] sm:$0xff]  }
  0x45   : > { %v2380_v18 = vld [vmem:[%s2641_s8 + $0x138] sm:$0xff]   ;;  %v2381_v19 = vld [vmem:[%s2641_s8 + $0x80] sm:$0xff]   ;;  %v2383_v21 = vld [vmem:[%s2641_s8 + $0x88] sm:$0xff]  }
  0x46   : > { %v2382_v20 = vld [vmem:[%s2641_s8 + $0x140] sm:$0xff]   ;;  %v2384_v22 = vld [vmem:[%s2641_s8 + $0x148] sm:$0xff]   ;;  %v2385_v23 = vld [vmem:[%s2641_s8 + $0x90] sm:$0xff]  }
  0x47   : > { %v2386_v24 = vld [vmem:[%s2641_s8 + $0x150] sm:$0xff]   ;;  %v2387_v25 = vld [vmem:[%s2641_s8 + $0x98] sm:$0xff]   ;;  %v2389_v27 = vld [vmem:[%s2641_s8 + $0xa0] sm:$0xff]  }
  0x48   : > { %v2388_v26 = vld [vmem:[%s2641_s8 + $0x158] sm:$0xff]   ;;  %v2390_v28 = vld [vmem:[%s2641_s8 + $0x160] sm:$0xff]   ;;  %v2391_v29 = vld [vmem:[%s2641_s8 + $0xa8] sm:$0xff]  }
  0x49   : > { %v2392_v30 = vld [vmem:[%s2641_s8 + $0x168] sm:$0xff]   ;;  %v2393_v31 = vld [vmem:[%s2641_s8 + $0xb0] sm:$0xff]   ;;  %v2395_v33 = vld [vmem:[%s2641_s8 + $0xb8] sm:$0xff]  }
  0x4a   : > { %v2394_v32 = vld [vmem:[%s2641_s8 + $0x170] sm:$0xff]   ;;  %v2396_v34 = vld [vmem:[%s2641_s8 + $0x178] sm:$0xff]  }
  0x4b   : > { %2165 = vmatmul.mubr.msk.bf16.gmra.mxu0 %vm990_vm0, %v2355_v57  ;;  %2213 = vmatmul.mubr.msk.bf16.gmra.mxu1 %vm990_vm0, %v2356_v58 }
  0x4c   : > { %2168 = vmatprep.mubr.msk.bf16.mxu0 %vm990_vm0, %v2357_v59  ;;  %2216 = vmatprep.mubr.msk.bf16.mxu1 %vm990_vm0, %v2358_v60 }
  0x53   : > { %2169 = vmatmul.mubr.msk.bf16.gmra.mxu0 %vm990_vm0, %v2359_v61  ;;  %2217 = vmatmul.mubr.msk.bf16.gmra.mxu1 %vm990_vm0, %v2360_v62 }
  0x54   : > { %2172 = vmatprep.mubr.msk.bf16.mxu0 %vm990_vm0, %v2361_v63  ;;  %2220 = vmatprep.mubr.msk.bf16.mxu1 %vm990_vm0, %v2362_v0 }
  0x5b   : > { %2173 = vmatmul.mubr.msk.bf16.gmra.mxu0 %vm990_vm0, %v2363_v1  ;;  %2221 = vmatmul.mubr.msk.bf16.gmra.mxu1 %vm990_vm0, %v2364_v2 }
  0x5c   : > { %2176 = vmatprep.mubr.msk.bf16.mxu0 %vm990_vm0, %v2365_v3  ;;  %2224 = vmatprep.mubr.msk.bf16.mxu1 %vm990_vm0, %v2366_v4 }
  0x63   : > { %2177 = vmatmul.mubr.msk.bf16.gmra.mxu0 %vm990_vm0, %v2367_v5  ;;  %2225 = vmatmul.mubr.msk.bf16.gmra.mxu1 %vm990_vm0, %v2368_v6 }
  0x64   : > { %2180 = vmatprep.mubr.msk.bf16.mxu0 %vm990_vm0, %v2369_v7  ;;  %2228 = vmatprep.mubr.msk.bf16.mxu1 %vm990_vm0, %v2370_v8 }
  0x6b   : > { %2181 = vmatmul.mubr.msk.bf16.gmra.mxu0 %vm990_vm0, %v2371_v9  ;;  %2229 = vmatmul.mubr.msk.bf16.gmra.mxu1 %vm990_vm0, %v2372_v10 }
  0x6c   : > { %2184 = vmatprep.mubr.msk.bf16.mxu0 %vm990_vm0, %v2373_v11  ;;  %2232 = vmatprep.mubr.msk.bf16.mxu1 %vm990_vm0, %v2374_v12 }
  0x73   : > { %2185 = vmatmul.mubr.msk.bf16.gmra.mxu0 %vm990_vm0, %v2375_v13  ;;  %2233 = vmatmul.mubr.msk.bf16.gmra.mxu1 %vm990_vm0, %v2376_v14 }
  0x74   : > { %2188 = vmatprep.mubr.msk.bf16.mxu0 %vm990_vm0, %v2377_v15  ;;  %2236 = vmatprep.mubr.msk.bf16.mxu1 %vm990_vm0, %v2378_v16 }
  0x7b   : > { %2189 = vmatmul.mubr.msk.bf16.gmra.mxu0 %vm990_vm0, %v2379_v17  ;;  %2237 = vmatmul.mubr.msk.bf16.gmra.mxu1 %vm990_vm0, %v2380_v18 }
  0x7c   : > { %2192 = vmatprep.mubr.msk.bf16.mxu0 %vm990_vm0, %v2381_v19  ;;  %2240 = vmatprep.mubr.msk.bf16.mxu1 %vm990_vm0, %v2382_v20 }
  0x83   : > { %2193 = vmatmul.mubr.msk.bf16.gmra.mxu0 %vm990_vm0, %v2383_v21  ;;  %2241 = vmatmul.mubr.msk.bf16.gmra.mxu1 %vm990_vm0, %v2384_v22 }
  0x84   : > { %2196 = vmatprep.mubr.msk.bf16.mxu0 %vm990_vm0, %v2385_v23  ;;  %2244 = vmatprep.mubr.msk.bf16.mxu1 %vm990_vm0, %v2386_v24 }
  0x8b   : > { %2197 = vmatmul.mubr.msk.bf16.gmra.mxu0 %vm990_vm0, %v2387_v25  ;;  %2245 = vmatmul.mubr.msk.bf16.gmra.mxu1 %vm990_vm0, %v2388_v26 }
  0x8c   : > { %2200 = vmatprep.mubr.msk.bf16.mxu0 %vm990_vm0, %v2389_v27  ;;  %2248 = vmatprep.mubr.msk.bf16.mxu1 %vm990_vm0, %v2390_v28 }
  0x93   : > { %2201 = vmatmul.mubr.msk.bf16.gmra.mxu0 %vm990_vm0, %v2391_v29  ;;  %2249 = vmatmul.mubr.msk.bf16.gmra.mxu1 %vm990_vm0, %v2392_v30 }
  0x94   : > { %2204 = vmatprep.mubr.msk.bf16.mxu0 %vm990_vm0, %v2393_v31  ;;  %2252 = vmatprep.mubr.msk.bf16.mxu1 %vm990_vm0, %v2394_v32 }
  0x9b   : > { %2205 = vmatmul.mubr.msk.bf16.gmra.mxu0 %vm990_vm0, %v2395_v33  ;;  %2253 = vmatmul.mubr.msk.bf16.gmra.mxu1 %vm990_vm0, %v2396_v34 }
 0x103   : > { %v2162_v35 = vpop.f32.mrf.mxu0  ;;  %v2210_v36 = vpop.f32.mrf.mxu1 }
 0x104   : > { %v1554_v49 = vmax.f32 %v2162_v35, 0.0  ;;  %v1602_v50 = vmax.f32 %v2210_v36, 0.0 }
 0x105   : > { %v1169_v37 = vpop.f32.mrf.mxu0  ;;  %v1361_v38 = vpop.f32.mrf.mxu1 }
 0x106   : > { %v1552_v43 = vmax.f32 %v1169_v37, 0.0  ;;  %v1600_v44 = vmax.f32 %v1361_v38, 0.0 }
 0x107   : > { %v2163_v39 = vpop.f32.mrf.mxu0  ;;  %v2211_v40 = vpop.f32.mrf.mxu1 }
 0x108   : > { %v1555_v53 = vmax.f32 %v2163_v39, 0.0  ;;  %v1603_v56 = vmax.f32 %v2211_v40, 0.0 }
 0x109   : > { %v1172_v41 = vpop.f32.mrf.mxu0  ;;  %v1364_v42 = vpop.f32.mrf.mxu1 }
 0x10a   : > { %v1553_v45 = vmax.f32 %v1172_v41, 0.0  ;;  %v1601_v46 = vmax.f32 %v1364_v42, 0.0 }
 0x10b   : > { %v2166_v47 = vpop.f32.mrf.mxu0  ;;  %v2214_v48 = vpop.f32.mrf.mxu1 }
 0x10c   : > { %v1649_v51 = vadd.f32 %v1553_v45, %v1552_v43  ;;  %v1717_v52 = vadd.f32 %v1601_v46, %v1600_v44  ;;  %v1558_v9 = vmax.f32 %v2166_v47, 0.0  ;;  %v1606_v10 = vmax.f32 %v2214_v48, 0.0 }
 0x10d   : > { %v1185_v54 = vpop.f32.mrf.mxu0  ;;  %v1377_v55 = vpop.f32.mrf.mxu1 }
 0x10e   : > { %v1650_v57 = vadd.f32 %v1649_v51, %v1554_v49  ;;  %v1718_v58 = vadd.f32 %v1717_v52, %v1602_v50  ;;  %v1604_v59 = vmax.f32 %v1377_v55, 0.0  ;;  %v1556_v62 = vmax.f32 %v1185_v54, 0.0 }
 0x10f   : > { %v2167_v60 = vpop.f32.mrf.mxu0  ;;  %v2215_v61 = vpop.f32.mrf.mxu1 }
 0x110   : > { %v1651_v63 = vadd.f32 %v1650_v57, %v1555_v53  ;;  %v1719_v0 = vadd.f32 %v1718_v58, %v1603_v56  ;;  %v1559_v13 = vmax.f32 %v2167_v60, 0.0  ;;  %v1607_v16 = vmax.f32 %v2215_v61, 0.0 }
 0x111   : > { %v1188_v1 = vpop.f32.mrf.mxu0  ;;  %v1380_v2 = vpop.f32.mrf.mxu1 }
 0x112   : > { %v1652_v3 = vadd.f32 %v1651_v63, %v1556_v62  ;;  %v1720_v4 = vadd.f32 %v1719_v0, %v1604_v59  ;;  %v1557_v5 = vmax.f32 %v1188_v1, 0.0  ;;  %v1605_v6 = vmax.f32 %v1380_v2, 0.0 }
 0x113   : > { %v2170_v7 = vpop.f32.mrf.mxu0  ;;  %v2218_v8 = vpop.f32.mrf.mxu1 }
 0x114   : > { %v1653_v11 = vadd.f32 %v1652_v3, %v1557_v5  ;;  %v1721_v12 = vadd.f32 %v1720_v4, %v1605_v6  ;;  %v1562_v33 = vmax.f32 %v2170_v7, 0.0  ;;  %v1610_v34 = vmax.f32 %v2218_v8, 0.0 }
 0x115   : > { %v1201_v14 = vpop.f32.mrf.mxu0  ;;  %v1393_v15 = vpop.f32.mrf.mxu1 }
 0x116   : > { %v1654_v17 = vadd.f32 %v1653_v11, %v1558_v9  ;;  %v1722_v18 = vadd.f32 %v1721_v12, %v1606_v10  ;;  %v1608_v19 = vmax.f32 %v1393_v15, 0.0  ;;  %v1560_v22 = vmax.f32 %v1201_v14, 0.0 }
 0x117   : > { %v2171_v20 = vpop.f32.mrf.mxu0  ;;  %v2219_v21 = vpop.f32.mrf.mxu1 }
 0x118   : > { %v1655_v23 = vadd.f32 %v1654_v17, %v1559_v13  ;;  %v1723_v24 = vadd.f32 %v1722_v18, %v1607_v16  ;;  %v1563_v39 = vmax.f32 %v2171_v20, 0.0  ;;  %v1611_v40 = vmax.f32 %v2219_v21, 0.0 }
 0x119   : > { %v1204_v25 = vpop.f32.mrf.mxu0  ;;  %v1396_v26 = vpop.f32.mrf.mxu1 }
 0x11a   : > { %v1656_v27 = vadd.f32 %v1655_v23, %v1560_v22  ;;  %v1724_v28 = vadd.f32 %v1723_v24, %v1608_v19  ;;  %v1561_v29 = vmax.f32 %v1204_v25, 0.0  ;;  %v1609_v30 = vmax.f32 %v1396_v26, 0.0 }
 0x11b   : > { %v2174_v31 = vpop.f32.mrf.mxu0  ;;  %v2222_v32 = vpop.f32.mrf.mxu1 }
 0x11c   : > { %v1657_v35 = vadd.f32 %v1656_v27, %v1561_v29  ;;  %v1725_v36 = vadd.f32 %v1724_v28, %v1609_v30  ;;  %v1566_v2 = vmax.f32 %v2174_v31, 0.0  ;;  %v1614_v14 = vmax.f32 %v2222_v32, 0.0 }
 0x11d   : > { %v1217_v37 = vpop.f32.mrf.mxu0  ;;  %v1409_v38 = vpop.f32.mrf.mxu1 }
 0x11e   : > { %v1658_v41 = vadd.f32 %v1657_v35, %v1562_v33  ;;  %v1726_v42 = vadd.f32 %v1725_v36, %v1610_v34  ;;  %v1564_v60 = vmax.f32 %v1217_v37, 0.0  ;;  %v1612_v6 = vmax.f32 %v1409_v38, 0.0 }
 0x11f   : > { %v2175_v43 = vpop.f32.mrf.mxu0  ;;  %v2223_v44 = vpop.f32.mrf.mxu1 }
 0x120   : > { %v2746_v45 = vadd.f32 %v1658_v41, %v1563_v39  ;;  %v2748_v46 = vadd.f32 %v1726_v42, %v1611_v40  ;;  %v1567_v10 = vmax.f32 %v2175_v43, 0.0  ;;  %v1615_v26 = vmax.f32 %v2223_v44, 0.0 }
 0x121   : > { %v1220_v47 = vpop.f32.mrf.mxu0  ;;  %v1412_v48 = vpop.f32.mrf.mxu1 }
 0x122   : > { %v1565_v57 = vmax.f32 %v1220_v47, 0.0  ;;  %v1613_v3 = vmax.f32 %v1412_v48, 0.0 }
 0x123   : > { %v2750_v49 = vpop.f32.mrf.mxu0  ;;  %v2752_v50 = vpop.f32.mrf.mxu1 }
 0x124   : > { %v1666_v63 = vadd.f32 %v1565_v57, %v1564_v60  ;;  %v1734_v11 = vadd.f32 %v1613_v3, %v1612_v6  ;;  %v1570_v60 = vmax.f32 %v2750_v49, 0.0 }
 0x125   : > { %v1233_v51 = vpop.f32.mrf.mxu0  ;;  %v2754_v52 = vpop.f32.mrf.mxu1 }
 0x126   : > { %v1667_v7 = vadd.f32 %v1666_v63, %v1566_v2  ;;  %v1735_v18 = vadd.f32 %v1734_v11, %v1614_v14  ;;  %v1568_v19 = vmax.f32 %v1233_v51, 0.0  ;;  %v1616_v35 = vmax.f32 %v2754_v52, 0.0 }
 0x127   : > { %v2756_v53 = vpop.f32.mrf.mxu0  ;;  %v2758_v54 = vpop.f32.mrf.mxu1 }
 0x128   : > { %v1668_v15 = vadd.f32 %v1667_v7, %v1567_v10  ;;  %v1736_v36 = vadd.f32 %v1735_v18, %v1615_v26 }
 0x129   : > { %v1236_v55 = vpop.f32.mrf.mxu0  ;;  %v2760_v56 = vpop.f32.mrf.mxu1 }
 0x12a   : > { %v1669_v27 = vadd.f32 %v1668_v15, %v1568_v19  ;;  %v1569_v28 = vmax.f32 %v1236_v55, 0.0  ;;  %v1737_v63 = vadd.f32 %v1736_v36, %v1616_v35  ;;  %v1617_v2 = vmax.f32 %v2760_v56, 0.0 }
 0x12b   : > { %v2762_v58 = vpop.f32.mrf.mxu0  ;;  %v2764_v59 = vpop.f32.mrf.mxu1  ;;  %v1571_v15 = vmax.f32 %v2756_v53, 0.0  ;;  %v1618_v56 = vmax.f32 %v2752_v50, 0.0 }
 0x12c   : > { %v1670_v43 = vadd.f32 %v1669_v27, %v1569_v28 }
 0x12d   : > { %v2766_v61 = vpop.f32.mrf.mxu0  ;;  %v2768_v62 = vpop.f32.mrf.mxu1 }
 0x12e   : > { %v1620_v36 = vmax.f32 %v2768_v62, 0.0 }
 0x12f   : > { %v2770_v0 = vpop.f32.mrf.mxu0  ;;  %v2772_v1 = vpop.f32.mrf.mxu1 }
 0x131   : > { %v2774_v4 = vpop.f32.mrf.mxu0  ;;  %v2776_v5 = vpop.f32.mrf.mxu1 }
 0x133   : > { %v2186_v8 = vpop.f32.mrf.mxu0  ;;  %v2234_v9 = vpop.f32.mrf.mxu1 }
 0x134   : > { %v1578_v31 = vmax.f32 %v2186_v8, 0.0  ;;  %v1626_v33 = vmax.f32 %v2234_v9, 0.0  ;;  %v1671_v8 = vadd.f32 %v1670_v43, %v1570_v60 }
 0x135   : > { %v1265_v12 = vpop.f32.mrf.mxu0  ;;  %v1457_v13 = vpop.f32.mrf.mxu1 }
 0x136   : > { %v1576_v22 = vmax.f32 %v1265_v12, 0.0  ;;  %v1624_v23 = vmax.f32 %v1457_v13, 0.0  ;;  %v1672_v19 = vadd.f32 %v1671_v8, %v1571_v15 }
 0x137   : > { %v2187_v16 = vpop.f32.mrf.mxu0  ;;  %v2235_v17 = vpop.f32.mrf.mxu1 }
 0x138   : > { %v1579_v39 = vmax.f32 %v2187_v16, 0.0  ;;  %v1627_v40 = vmax.f32 %v2235_v17, 0.0  ;;  %v1738_v16 = vadd.f32 %v1737_v63, %v1617_v2 }
 0x139   : > { %v1268_v20 = vpop.f32.mrf.mxu0  ;;  %v1460_v21 = vpop.f32.mrf.mxu1 }
 0x13a   : > { %v1577_v24 = vmax.f32 %v1268_v20, 0.0  ;;  %v1625_v25 = vmax.f32 %v1460_v21, 0.0 }
 0x13b   : > { %v2190_v29 = vpop.f32.mrf.mxu0  ;;  %v2238_v30 = vpop.f32.mrf.mxu1 }
 0x13c   : > { %v1683_v34 = vadd.f32 %v1577_v24, %v1576_v22  ;;  %v1751_v32 = vadd.f32 %v1625_v25, %v1624_v23  ;;  %v1582_v13 = vmax.f32 %v2190_v29, 0.0  ;;  %v1739_v24 = vadd.f32 %v1738_v16, %v1618_v56 }
 0x13d   : > { %v1281_v37 = vpop.f32.mrf.mxu0  ;;  %v1473_v38 = vpop.f32.mrf.mxu1  ;;  %v1572_v25 = vmax.f32 %v2766_v61, 0.0  ;;  %v1630_v26 = vmax.f32 %v2238_v30, 0.0  ;;  %v1619_v29 = vmax.f32 %v2758_v54, 0.0 }
 0x13e   : > { %v1684_v41 = vadd.f32 %v1683_v34, %v1578_v31  ;;  %v1752_v42 = vadd.f32 %v1751_v32, %v1626_v33  ;;  %v1628_v47 = vmax.f32 %v1473_v38, 0.0  ;;  %v1580_v51 = vmax.f32 %v1281_v37, 0.0 }
 0x13f   : > { %v2191_v44 = vpop.f32.mrf.mxu0  ;;  %v2239_v48 = vpop.f32.mrf.mxu1  ;;  %v1673_v31 = vadd.f32 %v1672_v19, %v1572_v25  ;;  %v1573_v33 = vmax.f32 %v2774_v4, 0.0  ;;  %v1740_v37 = vadd.f32 %v1739_v24, %v1619_v29 }
 0x140   : > { %v1685_v55 = vadd.f32 %v1684_v41, %v1579_v39  ;;  %v1753_v57 = vadd.f32 %v1752_v42, %v1627_v40  ;;  %v1583_v20 = vmax.f32 %v2191_v44, 0.0  ;;  %v1631_v38 = vmax.f32 %v2239_v48, 0.0 }
 0x141   : > { %v1284_v52 = vpop.f32.mrf.mxu0  ;;  %v1476_v3 = vpop.f32.mrf.mxu1  ;;  %v1674_v41 = vadd.f32 %v1673_v31, %v1573_v33  ;;  %v1574_v44 = vmax.f32 %v2762_v58, 0.0  ;;  %v1741_v4 = vadd.f32 %v1740_v37, %v1620_v36 }
 0x142   : > { %v1686_v6 = vadd.f32 %v1685_v55, %v1580_v51  ;;  %v1581_v7 = vmax.f32 %v1284_v52, 0.0  ;;  %v1754_v9 = vadd.f32 %v1753_v57, %v1628_v47  ;;  %v1629_v10 = vmax.f32 %v1476_v3, 0.0 }
 0x143   : > { %v2781_v11 = vpop.f32.mrf.mxu0  ;;  %v2783_v12 = vpop.f32.mrf.mxu1  ;;  %v1621_v51 = vmax.f32 %v2776_v5, 0.0  ;;  %v1675_v52 = vadd.f32 %v1674_v41, %v1574_v44  ;;  %v1575_v5 = vmax.f32 %v2770_v0, 0.0 }
 0x144   : > { %v1687_v14 = vadd.f32 %v1686_v6, %v1581_v7  ;;  %v1755_v21 = vadd.f32 %v1754_v9, %v1629_v10  ;;  %v1586_v3 = vmax.f32 %v2781_v11, 0.0  ;;  %v1622_v11 = vmax.f32 %v2764_v59, 0.0 }
 0x145   : > { %v1297_v49 = vpop.f32.mrf.mxu0  ;;  %v1489_v17 = vpop.f32.mrf.mxu1  ;;  %v1742_v15 = vadd.f32 %v1741_v4, %v1621_v51 }
 0x146   : > { %v1688_v18 = vadd.f32 %v1687_v14, %v1582_v13  ;;  %v1756_v50 = vadd.f32 %v1755_v21, %v1630_v26  ;;  %v1584_v34 = vmax.f32 %v1297_v49, 0.0  ;;  %v1632_v42 = vmax.f32 %v1489_v17, 0.0 }
 0x147   : > { %v2787_v22 = vpop.f32.mrf.mxu0  ;;  %v2789_v23 = vpop.f32.mrf.mxu1  ;;  %v1676_v21 = vadd.f32 %v1675_v52, %v1575_v5  ;;  %v1743_v31 = vadd.f32 %v1742_v15, %v1622_v11 }
 0x148   : > { %v1689_v27 = vadd.f32 %v1688_v18, %v1583_v20  ;;  %v1757_v43 = vadd.f32 %v1756_v50, %v1631_v38  ;;  %v1587_v24 = vmax.f32 %v2787_v22, 0.0  ;;  %v1660_v22 = vrot.slane %v2746_v45, 4 }
 0x149   : > { %v1300_v28 = vpop.f32.mrf.mxu0  ;;  %v1492_v53 = vpop.f32.mrf.mxu1  ;;  %v1635_v4 = vmax.f32 %v2789_v23, 0.0 }
 0x14a   : > { %v1690_v39 = vadd.f32 %v1689_v27, %v1584_v34  ;;  %v1585_v40 = vmax.f32 %v1300_v28, 0.0  ;;  %v1758_v6 = vadd.f32 %v1757_v43, %v1632_v42  ;;  %v1633_v7 = vmax.f32 %v1492_v53, 0.0 }
 0x14b   : > { %v2198_v32 = vpop.f32.mrf.mxu0  ;;  %v2246_v35 = vpop.f32.mrf.mxu1  ;;  %v1634_v34 = vmax.f32 %v2783_v12, 0.0 }
 0x14c   : > { %v1691_v55 = vadd.f32 %v1690_v39, %v1585_v40  ;;  %v1590_v10 = vmax.f32 %v2198_v32, 0.0  ;;  %v1638_v13 = vmax.f32 %v2246_v35, 0.0  ;;  %v1759_v28 = vadd.f32 %v1758_v6, %v1633_v7 }
 0x14d   : > { %v1313_v61 = vpop.f32.mrf.mxu0  ;;  %v1505_v30 = vpop.f32.mrf.mxu1  ;;  %v1623_v40 = vmax.f32 %v2772_v1, 0.0  ;;  %v1728_v1 = vrot.slane %v2748_v46, 4  ;;  %v1661_v6 = vadd.f32 %v1660_v22, %v2746_v45 }
 0x14e   : > { %v1588_v62 = vmax.f32 %v1313_v61, 0.0  ;;  %v1636_v63 = vmax.f32 %v1505_v30, 0.0  ;;  %v1692_v16 = vadd.f32 %v1691_v55, %v1586_v3  ;;  %v1677_v61 = vrot.slane %v1676_v21, 4 }
 0x14f   : > { %v2199_v47 = vpop.f32.mrf.mxu0  ;;  %v2247_v54 = vpop.f32.mrf.mxu1  ;;  %v1760_v30 = vadd.f32 %v1759_v28, %v1634_v34  ;;  %v1744_v12 = vadd.f32 %v1743_v31, %v1623_v40  ;;  %v1662_v11 = vrot.slane %v1661_v6, 2  ;;  %v1729_v45 = vadd.f32 %v1728_v1, %v2748_v46 }
 0x150   : > { %v1591_v18 = vmax.f32 %v2199_v47, 0.0  ;;  %v1639_v56 = vmax.f32 %v2247_v54, 0.0  ;;  %v1693_v32 = vadd.f32 %v1692_v16, %v1587_v24  ;;  %v1678_v52 = vadd.f32 %v1677_v61, %v1676_v21 }
 0x151   : > { %v1316_v57 = vpop.f32.mrf.mxu0  ;;  %v1508_v60 = vpop.f32.mrf.mxu1  ;;  %v1761_v3 = vadd.f32 %v1760_v30, %v1635_v4  ;;  %v1745_v23 = vrot.slane %v1744_v12, 4  ;;  %v1663_v34 = vadd.f32 %v1662_v11, %v1661_v6 }
 0x152   : > { %v1589_v48 = vmax.f32 %v1316_v57, 0.0  ;;  %v1637_v2 = vmax.f32 %v1508_v60, 0.0  ;;  %v1694_v51 = vrot.slane %v1693_v32, 4 }
 0x153   : > { %v2202_v8 = vpop.f32.mrf.mxu0  ;;  %v2250_v9 = vpop.f32.mrf.mxu1  ;;  %v1746_v21 = vadd.f32 %v1745_v23, %v1744_v12  ;;  %v1664_v40 = vrot.slane %v1663_v34, 1 }
 0x154   : > { %v1700_v58 = vadd.f32 %v1589_v48, %v1588_v62  ;;  %v1768_v14 = vadd.f32 %v1637_v2, %v1636_v63  ;;  %v1594_v41 = vmax.f32 %v2202_v8, 0.0  ;;  %v1642_v42 = vmax.f32 %v2250_v9, 0.0 }
 0x155   : > { %v1329_v49 = vpop.f32.mrf.mxu0  ;;  %v1521_v17 = vpop.f32.mrf.mxu1  ;;  %v1665_v4 = vadd.f32 %v1664_v40, %v1663_v34 }
 0x156   : > { %v1701_v19 = vadd.f32 %v1700_v58, %v1590_v10  ;;  %v1769_v20 = vadd.f32 %v1768_v14, %v1638_v13  ;;  %v1640_v25 = vmax.f32 %v1521_v17, 0.0  ;;  %v1592_v53 = vmax.f32 %v1329_v49, 0.0 }
 0x157   : > { %v2203_v26 = vpop.f32.mrf.mxu0  ;;  %v2251_v27 = vpop.f32.mrf.mxu1  ;;  %v1695_v58 = vadd.f32 %v1694_v51, %v1693_v32  ;;  %v1679_v49 = vrot.slane %v1678_v52, 2  ;;  %v1762_v17 = vrot.slane %v1761_v3, 4  ;;  %v1747_v32 = vrot.slane %v1746_v21, 2 }
 0x158   : > { %v1702_v29 = vadd.f32 %v1701_v19, %v1591_v18  ;;  %v1770_v0 = vadd.f32 %v1769_v20, %v1639_v56  ;;  %v1595_v55 = vmax.f32 %v2203_v26, 0.0  ;;  %v1643_v57 = vmax.f32 %v2251_v27, 0.0 }
 0x159   : > { %v1332_v33 = vpop.f32.mrf.mxu0  ;;  %v1524_v50 = vpop.f32.mrf.mxu1  ;;  %v1696_v24 = vrot.slane %v1695_v58, 2  ;;  %v1748_v61 = vadd.f32 %v1747_v32, %v1746_v21 }
 0x15a   : > { %v1703_v35 = vadd.f32 %v1702_v29, %v1592_v53  ;;  %v1771_v36 = vadd.f32 %v1770_v0, %v1640_v25  ;;  %v1593_v37 = vmax.f32 %v1332_v33, 0.0  ;;  %v1641_v59 = vmax.f32 %v1524_v50, 0.0 }
 0x15b   : > { %v2206_v38 = vpop.f32.mrf.mxu0  ;;  %v2254_v39 = vpop.f32.mrf.mxu1  ;;  %v1763_v53 = vadd.f32 %v1762_v17, %v1761_v3  ;;  %v1680_v29 = vadd.f32 %v1679_v49, %v1678_v52  ;;  %v1730_v33 = vrot.slane %v1729_v45, 2  ;;  %v1697_v50 = vadd.f32 %v1696_v24, %v1695_v58 }
 0x15c   : > { %v1704_v43 = vadd.f32 %v1703_v35, %v1593_v37  ;;  %v1772_v47 = vadd.f32 %v1771_v36, %v1641_v59  ;;  %v1598_v18 = vmax.f32 %v2206_v38, 0.0  ;;  %v1646_v56 = vmax.f32 %v2254_v39, 0.0 }
 0x15d   : > { %v1345_v54 = vpop.f32.mrf.mxu0  ;;  %v1537_v44 = vpop.f32.mrf.mxu1  ;;  %v1764_v37 = vrot.slane %v1763_v53, 2  ;;  %v1681_v59 = vrot.slane %v1680_v29, 1  ;;  %v1731_v39 = vadd.f32 %v1730_v33, %v1729_v45  ;;  %v1698_v22 = vrot.slane %v1697_v50, 1 }
 0x15e   : > { %v1705_v60 = vadd.f32 %v1704_v43, %v1594_v41  ;;  %v1773_v62 = vadd.f32 %v1772_v47, %v1642_v42  ;;  %v1644_v63 = vmax.f32 %v1537_v44, 0.0  ;;  %v1596_v7 = vmax.f32 %v1345_v54, 0.0 }
 0x15f   : > { %v2207_v48 = vpop.f32.mrf.mxu0  ;;  %v2255_v2 = vpop.f32.mrf.mxu1  ;;  %v1765_v42 = vadd.f32 %v1764_v37, %v1763_v53  ;;  %v1682_v43 = vadd.f32 %v1681_v59, %v1680_v29  ;;  %v1732_v44 = vrot.slane %v1731_v39, 1  ;;  %v1699_v12 = vadd.f32 %v1698_v22, %v1697_v50 }
 0x160   : > { %v1706_v8 = vadd.f32 %v1705_v60, %v1595_v55  ;;  %v1774_v9 = vadd.f32 %v1773_v62, %v1643_v57  ;;  %v1599_v25 = vmax.f32 %v2207_v48, 0.0  ;;  %v1647_v26 = vmax.f32 %v2255_v2, 0.0 }
 0x161   : > { %v1348_v10 = vpop.f32.mrf.mxu0  ;;  %v1540_v13 = vpop.f32.mrf.mxu1  ;;  %v1749_v51 = vrot.slane %v1748_v61, 1  ;;  %v1766_v57 = vrot.slane %v1765_v42, 1  ;;  %v1794_v60 = vsel %vm1793_vm1, %v1682_v43, %v1665_v4  ;;  %v1733_v48 = vadd.f32 %v1732_v44, %v1731_v39 }
 0x162   : > { %v1597_v14 = vmax.f32 %v1348_v10, 0.0  ;;  %v1645_v5 = vmax.f32 %v1540_v13, 0.0  ;;  %v1707_v15 = vadd.f32 %v1706_v8, %v1596_v7  ;;  %v1775_v16 = vadd.f32 %v1774_v9, %v1644_v63  ;;  %v1648_v7 = vld [vmem:[#allocation2] sm:$0xff] }
 0x163   : > { %v1796_v2 = vsel %vm1795_vm2, %v1699_v12, %v1794_v60  ;;  %v1750_v1 = vadd.f32 %v1749_v51, %v1748_v61  ;;  %v1767_v3 = vadd.f32 %v1766_v57, %v1765_v42 }
 0x164   : > { %v1708_v19 = vadd.f32 %v1707_v15, %v1597_v14  ;;  %v1776_v20 = vadd.f32 %v1775_v16, %v1645_v5 }
 0x166   : > { %v1709_v27 = vadd.f32 %v1708_v19, %v1598_v18  ;;  %v1777_v28 = vadd.f32 %v1776_v20, %v1646_v56 }
 0x168   : > { %v1710_v0 = vadd.f32 %v1709_v27, %v1599_v25  ;;  %v1778_v31 = vadd.f32 %v1777_v28, %v1647_v26 }
 0x16a   : > { %v1711_v35 = vrot.slane %v1710_v0, 4  ;;  %v1779_v36 = vrot.slane %v1778_v31, 4 }
 0x16c   : > { %v1712_v38 = vadd.f32 %v1711_v35, %v1710_v0  ;;  %v1780_v46 = vadd.f32 %v1779_v36, %v1778_v31 }
 0x16e   : > { %v1713_v30 = vrot.slane %v1712_v38, 2  ;;  %v1781_v41 = vrot.slane %v1780_v46, 2 }
 0x170   : > { %v1714_v47 = vadd.f32 %v1713_v30, %v1712_v38  ;;  %v1782_v54 = vadd.f32 %v1781_v41, %v1780_v46 }
 0x172   : > { %v1715_v55 = vrot.slane %v1714_v47, 1  ;;  %v1783_v63 = vrot.slane %v1782_v54, 1 }
 0x174   : > { %v1716_v62 = vadd.f32 %v1715_v55, %v1714_v47  ;;  %v1784_v8 = vadd.f32 %v1783_v63, %v1782_v54 }
 0x176   : > { %v1798_v52 = vsel %vm1797_vm3, %v1716_v62, %v1796_v2 }
 0x177   : > { %v1800_v6 = vsel %vm1799_vm4, %v1733_v48, %v1798_v52 }
 0x178   : > { %v1802_v9 = vsel %vm1801_vm5, %v1750_v1, %v1800_v6 }
 0x179   : > { %v1804_v10 = vsel %vm1803_vm6, %v1767_v3, %v1802_v9  ;;  %1813 = sbr.rel (%p2082_p10) target bundleno = 611 (0x263), region = 85 }
 0x17a   : > { %v1806_v13 = vsel %vm1805_vm7, %v1784_v8, %v1804_v10 }
 0x17b   : > { %v1808_v23 = vadd.f32 %v1806_v13, %v1648_v7 }
 0x17d   : > { %1809 = vst [vmem:[#allocation2] sm:$0xff] %v1808_v23 }
 0x17e   : > { %v1831_v58 = vld [vmem:[%s2894_s2 + $0x78] sm:$0xff]  ;;  %v2466_v14 = vmov 0.0   ;;  %v1830_v5 = vld [vmem:[%s2894_s2 + $0x70] sm:$0xff]  ;;  %vm2467_vm8 = vmmov 0   ;;  %v1829_v15 = vld [vmem:[%s2894_s2 + $0x68] sm:$0xff] }
 0x17f   : > { %2256 = vmatprep.subr.mxu0 %v2466_v14  ;;  %2288 = vmatprep.mubr.msk.f32.mxu0 %vm2467_vm8, %v2466_v14  ;;  %v1828_v16 = vld [vmem:[%s2894_s2 + $0x60] sm:$0xff]  ;;  %v1827_v49 = vld [vmem:[%s2894_s2 + $0x58] sm:$0xff]  ;;  %v1826_v17 = vld [vmem:[%s2894_s2 + $0x50] sm:$0xff] }
 0x180   : > { %2257 = vmatpush3.msra.mxu0 %v1831_v58  ;;  %v1825_v18 = vld [vmem:[%s2894_s2 + $0x48] sm:$0xff]  ;;  %v1824_v56 = vld [vmem:[%s2894_s2 + $0x40] sm:$0xff]  ;;  %v1823_v19 = vld [vmem:[%s2894_s2 + $0x38] sm:$0xff] }
 0x181   : > { %2258 = vmatprep.subr.mxu0 %v2466_v14  ;;  %v1822_v20 = vld [vmem:[%s2894_s2 + $0x30] sm:$0xff]  ;;  %v1821_v11 = vld [vmem:[%s2894_s2 + $0x28] sm:$0xff]  ;;  %v1820_v45 = vld [vmem:[%s2894_s2 + $0x20] sm:$0xff] }
 0x182   : > { %2259 = vmatpush3.msra.mxu0 %v1830_v5  ;;  %v1819_v21 = vld [vmem:[%s2894_s2 + $0x18] sm:$0xff]  ;;  %v1818_v24 = vld [vmem:[%s2894_s2 + $0x10] sm:$0xff]  ;;  %v1817_v26 = vld [vmem:[%s2894_s2 + $0x8] sm:$0xff] }
 0x183   : > { %2260 = vmatprep.subr.mxu0 %v2466_v14  ;;  %v1816_v27 = vld [vmem:[%s2894_s2] sm:$0xff] }
 0x184   : > { %2261 = vmatpush3.msra.mxu0 %v1829_v15  ;;  %v1814_v25 = vld [vmem:[#allocation2] sm:$0xff] }
 0x185   : > { %2262 = vmatprep.subr.mxu0 %v2466_v14  ;;  %v1815_v28 = vmul.f32 0.00390625, %v1814_v25  ;;  %v2083_v53 = vld [vmem:[%s2895_s3] ss:$0 sm:$0xff] }
 0x186   : > { %2263 = vmatpush3.msra.mxu0 %v1828_v16 }
 0x187   : > { %2264 = vmatprep.subr.mxu0 %v2466_v14 }
 0x188   : > { %2265 = vmatpush3.msra.mxu0 %v1827_v49 }
 0x189   : > { %2266 = vmatprep.subr.mxu0 %v2466_v14 }
 0x18a   : > { %2267 = vmatpush3.msra.mxu0 %v1826_v17 }
 0x18b   : > { %2268 = vmatprep.subr.mxu0 %v2466_v14 }
 0x18c   : > { %2269 = vmatpush3.msra.mxu0 %v1825_v18 }
 0x18d   : > { %2270 = vmatprep.subr.mxu0 %v2466_v14 }
 0x18e   : > { %2271 = vmatpush3.msra.mxu0 %v1824_v56 }
 0x18f   : > { %2272 = vmatprep.subr.mxu0 %v2466_v14 }
 0x190   : > { %2273 = vmatpush3.msra.mxu0 %v1823_v19 }
 0x191   : > { %2274 = vmatprep.subr.mxu0 %v2466_v14 }
 0x192   : > { %2275 = vmatpush3.msra.mxu0 %v1822_v20 }
 0x193   : > { %2276 = vmatprep.subr.mxu0 %v2466_v14 }
 0x194   : > { %2277 = vmatpush3.msra.mxu0 %v1821_v11 }
 0x195   : > { %2278 = vmatprep.subr.mxu0 %v2466_v14 }
 0x196   : > { %2279 = vmatpush3.msra.mxu0 %v1820_v45 }
 0x197   : > { %2280 = vmatprep.subr.mxu0 %v2466_v14 }
 0x198   : > { %2281 = vmatpush3.msra.mxu0 %v1819_v21 }
 0x199   : > { %2282 = vmatprep.subr.mxu0 %v2466_v14 }
 0x19a   : > { %2283 = vmatpush3.msra.mxu0 %v1818_v24 }
 0x19b   : > { %2284 = vmatprep.subr.mxu0 %v2466_v14 }
 0x19c   : > { %2285 = vmatpush3.msra.mxu0 %v1817_v26 }
 0x19d   : > { %2286 = vmatprep.subr.mxu0 %v2466_v14 }
 0x19e   : > { %2287 = vmatpush3.msra.mxu0 %v1816_v27 }
 0x19f   : > { %2289 = vmatmul.mubr.f32.vlgmr.msra.gmra.mxu0 %v1815_v28 }
 0x25f   : > { %v1905_v29 = vpop.f32.mrf.mxu0 }
 0x260   : > { %v1906_v0 = vadd.f32 %v2083_v53, %v1905_v29 }
 0x261   : > { %v2290_v31 = vpop.f32.mrf.mxu0 }
 0x262   : > { %1909 = vst [vmem:[#allocation4] sm:$0xff] %v1906_v0 }
 0x263 PF: > { %p2862_p11 = scmp.eq.s32.totalorder %s1978_s20, 2  ;;  %s2468_s8 = smov [#allocation4]  }
 0x264   : > { %s1919_s9 = sshll.u32 %s2468_s8, 4  ;;  %s1920_s9 = int_to_ptr.vmem [resolvable:$true] %s1919_s9 }
 0x265   : > { %s2397_s10 = scalar_lea.vmem %s1920_s9, 128  ;;  %p2404_p1 = scmp.lt.s32.totalorder %s1920_s9, %s1920_s9 }
 0x266   : > { %p2398_p12 = scmp.ne.s32.totalorder %s1920_s9, %s2397_s10  ;;  %p2405_p2 = scmp.lt.s32.totalorder %s2397_s10, %s2397_s10 }
 0x268   : > { %p2399_p13 = pnand %p2398_p12, %p2862_p11  ;;  %p2406_p3 = por %p2405_p2, %p2404_p1 }
 0x26a   : > { %p2400_p0 = pneg %p2399_p13 }
 0x26c   : > { %p2407_p4 = pnand %p2406_p3, %p2400_p0 }
 0x26e   : > { %2410 = shalt.err (!%p2407_p4)
}
 0x26f   : > { %2298 = dma.vmem_to_hbm [thread:$0]  (%p2862_p11), %s1920_s9, 128, %s2896_s4, [#allocation5]  }
 0x270   : > { %2442 = dma.done.wait (%p2862_p11), [#allocation5], 128  }
 0x271   : > { %2444 = vsyncadd (%p2862_p11), [#allocation5], 4294967168 }
 0x272 PF: > { %s15_s19 = sadd.s32 1, %s2463_s19   ;;  %s2898_s15 = smov %s2451_s16 }
 0x273   : > { %p12_p5 = scmp.ge.s32.totalorder %s15_s19, 5   ;;  %s2899_s16 = smov %s2530_s24 }
 0x274   : > { %s2900_s17 = smov %s2459_s18  ;;  %s2901_s18 = smov %s2903_s21 }
 0x275   :  { %14 = sbr.rel (!%p12_p5) target bundleno = 3 (0x3), region = 118 }
 0x27a   :  { %1932 = vsyncpa [#allocation5], 1 }
 0x27b   :  { %1934 = vsyncpa [#allocation5 + $0x1], 1 }

// kernel: tpu_custom_call.1
= control target key start
LH: loop header
LB: loop body
LE: loop exit
PB: predicated region body
PF: predicated region fallthrough
CT: control target
= control target key end

     0   :  { %9 = vsyncpa [#allocation5], 0  ;;  %s2494_s15 = smov 0   ;;  %s2496_s16 = smov 0   ;;  %s2892_s0 = inlined_call_operand.vmem [shape: bf16[8,288,32], index: 0, kind: input, shape index: {}]   ;;  %s2893_s1 = inlined_call_operand.vmem [shape: bf16[32,128], index: 1, kind: input, shape index: {}]   ;;  %s2894_s2 = inlined_call_operand.vmem [shape: f32[128,128], index: 2, kind: input, shape index: {}]   ;;  %s2895_s3 = inlined_call_operand.vmem [shape: f32[1,128], index: 3, kind: input, shape index: {}]   ;;  %s2896_s4 = inlined_call_operand.hbm [shape: f32[8,128], index: 4, kind: output, shape index: {}]  }
   0x1   :  { %s2498_s17 = smov 0   ;;  %s2500_s18 = smov 0  }
   0x2   :  { %s2502_s19 = smov 0  }
   0x3 LB: > { %s1978_s20 = sadd.s32 4294967295, %s2463_s19   ;;  %s24_s21 = sadd.s32 1, %s2459_s18  ;;  %s2463_s19 = sphi %s2502_s19, %s15_s19   ;;  %s2459_s18 = sphi %s2500_s18, %s2901_s18   ;;  %s2455_s17 = sphi %s2498_s17, %s2900_s17   ;;  %s2451_s16 = sphi %s2496_s16, %s2899_s16   ;;  %s2447_s15 = sphi %s2494_s15, %s2898_s15  }
   0x4   : > { %p25_p0 = scmp.ge.s32.totalorder %s24_s21, 3  ;;  %p43_p1 = scmp.ne.s32.totalorder %s2451_s16, %s2447_s15 }
   0x5   : > { %p44_p2 = scmp.eq.s32.totalorder %s2463_s19, 0  ;;  %s36_s23 = sadd.s32 1, %s2451_s16 }
   0x6   : > { %s2903_s21 = smov (%p25_p0, %s24_s21), 0  ;;  %p1980_p5 = scmp.ge.s32.totalorder %s2463_s19, 3 }
   0x7   : > { %p45_p3 = por %p44_p2, %p43_p1  ;;  %s32_s22 = ssub.s32 %s2459_s18, %s2903_s21 }
   0x8   : > { %p34_p4 = scmp.eq.s32.totalorder %s32_s22, 0  ;;  %167 = sbr.rel (%p1980_p5) target bundleno = 42 (0x2a), region = 28 }
   0xa   : > { %s2530_s24 = scalar_select %p34_p4, %s2451_s16, %s36_s23  }
   0xd   : > { %170 = sbr.rel (!%p45_p3) target bundleno = 42 (0x2a), region = 32  ;;  %s172_s25 = sand.u32 (%p45_p3), 1, %s2451_s16  }
   0xe   : > { %s2088_s26 = smul.u32 (%p45_p3), 48, %s2459_s18 }
   0xf   : > { %s2295_s27 = smul.u32 (%p45_p3), 384, %s172_s25 }
  0x10   : > { %s2538_s30 = scalar_lea.vmem (%p45_p3), %s2892_s0, %s2088_s26 }
  0x11   : > { %v197_v0 = vld [vmem:[%s2538_s30] sm:$0xff] (%p45_p3)   ;;  %v201_v1 = vld [vmem:[%s2538_s30 + $0x8] sm:$0xff] (%p45_p3)   ;;  %v205_v2 = vld [vmem:[%s2538_s30 + $0x10] sm:$0xff] (%p45_p3)   ;;  %s2543_s5 = scalar_lea.vmem (%p45_p3), [#allocation3], %s2295_s27 }
  0x12   : > { %198 = vst [vmem:[%s2543_s5] sm:$0xff] %v197_v0   ;;  %202 = vst [vmem:[%s2543_s5 + $0x8] sm:$0xff] %v201_v1   ;;  %v209_v3 = vld [vmem:[%s2538_s30 + $0x18] sm:$0xff]   ;;  %v213_v4 = vld [vmem:[%s2538_s30 + $0x20] sm:$0xff]  }
  0x13   : > { %206 = vst [vmem:[%s2543_s5 + $0x10] sm:$0xff] %v205_v2   ;;  %v217_v5 = vld [vmem:[%s2538_s30 + $0x28] sm:$0xff]   ;;  %210 = vst [vmem:[%s2543_s5 + $0x18] sm:$0xff] %v209_v3   ;;  %v221_v6 = vld [vmem:[%s2538_s30 + $0x90] sm:$0xff]  }
  0x14   : > { %214 = vst [vmem:[%s2543_s5 + $0x20] sm:$0xff] %v213_v4   ;;  %218 = vst [vmem:[%s2543_s5 + $0x28] sm:$0xff] %v217_v5   ;;  %v225_v7 = vld [vmem:[%s2538_s30 + $0x98] sm:$0xff]   ;;  %v229_v8 = vld [vmem:[%s2538_s30 + $0xa0] sm:$0xff]  }
  0x15   : > { %222 = vst [vmem:[%s2543_s5 + $0x30] sm:$0xff] %v221_v6   ;;  %226 = vst [vmem:[%s2543_s5 + $0x38] sm:$0xff] %v225_v7   ;;  %v233_v9 = vld [vmem:[%s2538_s30 + $0xa8] sm:$0xff]   ;;  %v237_v10 = vld [vmem:[%s2538_s30 + $0xb0] sm:$0xff]  }
  0x16   : > { %230 = vst [vmem:[%s2543_s5 + $0x40] sm:$0xff] %v229_v8   ;;  %v241_v11 = vld [vmem:[%s2538_s30 + $0xb8] sm:$0xff]   ;;  %234 = vst [vmem:[%s2543_s5 + $0x48] sm:$0xff] %v233_v9   ;;  %v245_v12 = vld [vmem:[%s2538_s30 + $0x120] sm:$0xff]  }
  0x17   : > { %238 = vst [vmem:[%s2543_s5 + $0x50] sm:$0xff] %v237_v10   ;;  %242 = vst [vmem:[%s2543_s5 + $0x58] sm:$0xff] %v241_v11   ;;  %v249_v13 = vld [vmem:[%s2538_s30 + $0x128] sm:$0xff]   ;;  %v253_v14 = vld [vmem:[%s2538_s30 + $0x130] sm:$0xff]  }
  0x18   : > { %246 = vst [vmem:[%s2543_s5 + $0x60] sm:$0xff] %v245_v12   ;;  %250 = vst [vmem:[%s2543_s5 + $0x68] sm:$0xff] %v249_v13   ;;  %v257_v15 = vld [vmem:[%s2538_s30 + $0x138] sm:$0xff]   ;;  %v261_v16 = vld [vmem:[%s2538_s30 + $0x140] sm:$0xff]  }
  0x19   : > { %254 = vst [vmem:[%s2543_s5 + $0x70] sm:$0xff] %v253_v14   ;;  %v265_v17 = vld [vmem:[%s2538_s30 + $0x148] sm:$0xff]   ;;  %258 = vst [vmem:[%s2543_s5 + $0x78] sm:$0xff] %v257_v15   ;;  %v269_v18 = vld [vmem:[%s2538_s30 + $0x1b0] sm:$0xff]  }
  0x1a   : > { %262 = vst [vmem:[%s2543_s5 + $0x80] sm:$0xff] %v261_v16   ;;  %266 = vst [vmem:[%s2543_s5 + $0x88] sm:$0xff] %v265_v17   ;;  %v273_v19 = vld [vmem:[%s2538_s30 + $0x1b8] sm:$0xff]   ;;  %v277_v20 = vld [vmem:[%s2538_s30 + $0x1c0] sm:$0xff]  }
  0x1b   : > { %270 = vst [vmem:[%s2543_s5 + $0x90] sm:$0xff] %v269_v18   ;;  %274 = vst [vmem:[%s2543_s5 + $0x98] sm:$0xff] %v273_v19   ;;  %v281_v21 = vld [vmem:[%s2538_s30 + $0x1c8] sm:$0xff]   ;;  %v285_v22 = vld [vmem:[%s2538_s30 + $0x1d0] sm:$0xff]  }
  0x1c   : > { %278 = vst [vmem:[%s2543_s5 + $0xa0] sm:$0xff] %v277_v20   ;;  %v289_v23 = vld [vmem:[%s2538_s30 + $0x1d8] sm:$0xff]   ;;  %282 = vst [vmem:[%s2543_s5 + $0xa8] sm:$0xff] %v281_v21   ;;  %v293_v24 = vld [vmem:[%s2538_s30 + $0x240] sm:$0xff]  }
  0x1d   : > { %286 = vst [vmem:[%s2543_s5 + $0xb0] sm:$0xff] %v285_v22   ;;  %290 = vst [vmem:[%s2543_s5 + $0xb8] sm:$0xff] %v289_v23   ;;  %v297_v25 = vld [vmem:[%s2538_s30 + $0x248] sm:$0xff]   ;;  %v301_v26 = vld [vmem:[%s2538_s30 + $0x250] sm:$0xff]  }
  0x1e   : > { %294 = vst [vmem:[%s2543_s5 + $0xc0] sm:$0xff] %v293_v24   ;;  %298 = vst [vmem:[%s2543_s5 + $0xc8] sm:$0xff] %v297_v25   ;;  %v305_v27 = vld [vmem:[%s2538_s30 + $0x258] sm:$0xff]   ;;  %v309_v28 = vld [vmem:[%s2538_s30 + $0x260] sm:$0xff]  }
  0x1f   : > { %302 = vst [vmem:[%s2543_s5 + $0xd0] sm:$0xff] %v301_v26   ;;  %v313_v29 = vld [vmem:[%s2538_s30 + $0x268] sm:$0xff]   ;;  %306 = vst [vmem:[%s2543_s5 + $0xd8] sm:$0xff] %v305_v27   ;;  %v317_v30 = vld [vmem:[%s2538_s30 + $0x2d0] sm:$0xff]  }
  0x20   : > { %310 = vst [vmem:[%s2543_s5 + $0xe0] sm:$0xff] %v309_v28   ;;  %314 = vst [vmem:[%s2543_s5 + $0xe8] sm:$0xff] %v313_v29   ;;  %v321_v31 = vld [vmem:[%s2538_s30 + $0x2d8] sm:$0xff]   ;;  %v325_v32 = vld [vmem:[%s2538_s30 + $0x2e0] sm:$0xff]  }
  0x21   : > { %318 = vst [vmem:[%s2543_s5 + $0xf0] sm:$0xff] %v317_v30   ;;  %322 = vst [vmem:[%s2543_s5 + $0xf8] sm:$0xff] %v321_v31   ;;  %v329_v33 = vld [vmem:[%s2538_s30 + $0x2e8] sm:$0xff]   ;;  %v333_v34 = vld [vmem:[%s2538_s30 + $0x2f0] sm:$0xff]  }
  0x22   : > { %326 = vst [vmem:[%s2543_s5 + $0x100] sm:$0xff] %v325_v32   ;;  %v337_v35 = vld [vmem:[%s2538_s30 + $0x2f8] sm:$0xff]   ;;  %330 = vst [vmem:[%s2543_s5 + $0x108] sm:$0xff] %v329_v33   ;;  %v341_v36 = vld [vmem:[%s2538_s30 + $0x360] sm:$0xff]  }
  0x23   : > { %334 = vst [vmem:[%s2543_s5 + $0x110] sm:$0xff] %v333_v34   ;;  %338 = vst [vmem:[%s2543_s5 + $0x118] sm:$0xff] %v337_v35   ;;  %v345_v37 = vld [vmem:[%s2538_s30 + $0x368] sm:$0xff]   ;;  %v349_v38 = vld [vmem:[%s2538_s30 + $0x370] sm:$0xff]  }
  0x24   : > { %342 = vst [vmem:[%s2543_s5 + $0x120] sm:$0xff] %v341_v36   ;;  %346 = vst [vmem:[%s2543_s5 + $0x128] sm:$0xff] %v345_v37   ;;  %v353_v39 = vld [vmem:[%s2538_s30 + $0x378] sm:$0xff]   ;;  %v357_v40 = vld [vmem:[%s2538_s30 + $0x380] sm:$0xff]  }
  0x25   : > { %350 = vst [vmem:[%s2543_s5 + $0x130] sm:$0xff] %v349_v38   ;;  %v361_v41 = vld [vmem:[%s2538_s30 + $0x388] sm:$0xff]   ;;  %354 = vst [vmem:[%s2543_s5 + $0x138] sm:$0xff] %v353_v39   ;;  %v365_v42 = vld [vmem:[%s2538_s30 + $0x3f0] sm:$0xff]  }
  0x26   : > { %358 = vst [vmem:[%s2543_s5 + $0x140] sm:$0xff] %v357_v40   ;;  %362 = vst [vmem:[%s2543_s5 + $0x148] sm:$0xff] %v361_v41   ;;  %v369_v43 = vld [vmem:[%s2538_s30 + $0x3f8] sm:$0xff]   ;;  %v373_v44 = vld [vmem:[%s2538_s30 + $0x400] sm:$0xff]  }
  0x27   : > { %366 = vst [vmem:[%s2543_s5 + $0x150] sm:$0xff] %v365_v42   ;;  %370 = vst [vmem:[%s2543_s5 + $0x158] sm:$0xff] %v369_v43   ;;  %v377_v45 = vld [vmem:[%s2538_s30 + $0x408] sm:$0xff]   ;;  %v381_v46 = vld [vmem:[%s2538_s30 + $0x410] sm:$0xff]  }
  0x28   : > { %374 = vst [vmem:[%s2543_s5 + $0x160] sm:$0xff] %v373_v44   ;;  %v385_v47 = vld [vmem:[%s2538_s30 + $0x418] sm:$0xff]   ;;  %378 = vst [vmem:[%s2543_s5 + $0x168] sm:$0xff] %v377_v45  }
  0x29   : > { %382 = vst [vmem:[%s2543_s5 + $0x170] sm:$0xff] %v381_v46   ;;  %386 = vst [vmem:[%s2543_s5 + $0x178] sm:$0xff] %v385_v47  }
  0x2a PF: > { %p1982_p6 = scmp.ge.s32.totalorder %s2463_s19, 1  ;;  %p603_p7 = scmp.lt.s32.totalorder %s2463_s19, 4 }
  0x2c   : > { %p604_p8 = pnand %p1982_p6, %p603_p7 }
  0x2d   : > { %s610_s6 = sand.u32 (!%p604_p8), 1, %s2447_s15   ;;  %p1983_p9 = scmp.ne.s32.totalorder (!%p604_p8), %s2455_s17, 0 }
  0x2e   : > { %607 = sbr.rel (%p604_p8) target bundleno = 626 (0x272), region = 73 }
  0x2f   : > { %s2296_s7 = smul.u32 (!%p604_p8), 384, %s610_s6 }
  0x31   : > { %s2641_s8 = scalar_lea.vmem (!%p604_p8), [#allocation3], %s2296_s7 }
  0x33   : > { %636 = sbr.rel (%p1983_p9) target bundleno = 58 (0x3a), region = 81 }
  0x38   : > { %v2465_v48 = vmov 0.0  }
  0x39   : > { %637 = vst [vmem:[#allocation2] sm:$0xff] %v2465_v48 }
  0x3a PF: > { %v2347_v49 = vld [vmem:[%s2893_s1 + $0x8] sm:$0xff]   ;;  %v2348_v50 = vld [vmem:[%s2893_s1] sm:$0xff]   ;;  %vm990_vm0 = vcmask 261120   ;;  %v2351_v53 = vld [vmem:[%s2641_s8 + $0x8] sm:$0xff]   ;;  %vm1793_vm1 = vcmask 1041409   ;;  %vm1795_vm2 = vcmask 1042434  }
  0x3b   : > { %2156 = vmatprep.subr.bf16.mxu0 %v2347_v49  ;;  %2291 = vmatprep.subr.bf16.mxu1 %v2347_v49  ;;  %v2349_v51 = vld [vmem:[%s2641_s8] sm:$0xff]   ;;  %v2352_v54 = vld [vmem:[%s2641_s8 + $0xc8] sm:$0xff]   ;;  %v2353_v55 = vld [vmem:[%s2641_s8 + $0x10] sm:$0xff]   ;;  %vm1797_vm3 = vcmask 1043459   ;;  %vm1799_vm4 = vcmask 1044484   ;;  %vm1801_vm5 = vcmask 1045509  }
  0x3c   : > { %2157 = vmatpush3.bf16.msra.mxu0 %v2347_v49  ;;  %2293 = vmatpush3.bf16.msra.mxu1 %v2347_v49  ;;  %v2350_v52 = vld [vmem:[%s2641_s8 + $0xc0] sm:$0xff]   ;;  %v2354_v56 = vld [vmem:[%s2641_s8 + $0xd0] sm:$0xff]   ;;  %v2355_v57 = vld [vmem:[%s2641_s8 + $0x18] sm:$0xff]   ;;  %vm1803_vm6 = vcmask 1046534   ;;  %vm1805_vm7 = vcmask 1047559   ;;  %p2082_p10 = scmp.ne.s32.totalorder %s2455_s17, 2 }
  0x3d   : > { %2158 = vmatprep.subr.bf16.mxu0 %v2348_v50  ;;  %2292 = vmatprep.subr.bf16.mxu1 %v2348_v50  ;;  %v2356_v58 = vld [vmem:[%s2641_s8 + $0xd8] sm:$0xff]   ;;  %v2357_v59 = vld [vmem:[%s2641_s8 + $0x20] sm:$0xff]   ;;  %v2359_v61 = vld [vmem:[%s2641_s8 + $0x28] sm:$0xff]  }
  0x3e   : > { %2160 = vmatprep.mubr.msk.bf16.mxu0 %vm990_vm0, %v2349_v51  ;;  %2208 = vmatprep.mubr.msk.bf16.mxu1 %vm990_vm0, %v2350_v52  ;;  %v2358_v60 = vld [vmem:[%s2641_s8 + $0xe0] sm:$0xff]   ;;  %v2360_v62 = vld [vmem:[%s2641_s8 + $0xe8] sm:$0xff]   ;;  %v2361_v63 = vld [vmem:[%s2641_s8 + $0x30] sm:$0xff]  }
  0x3f   : > { %v2362_v0 = vld [vmem:[%s2641_s8 + $0xf0] sm:$0xff]   ;;  %v2363_v1 = vld [vmem:[%s2641_s8 + $0x38] sm:$0xff]   ;;  %v2365_v3 = vld [vmem:[%s2641_s8 + $0x40] sm:$0xff]  }
  0x40   : > { %2159 = vmatpush3.bf16.msra.mxu0 %v2348_v50  ;;  %2294 = vmatpush3.bf16.msra.mxu1 %v2348_v50  ;;  %v2364_v2 = vld [vmem:[%s2641_s8 + $0xf8] sm:$0xff]   ;;  %v2366_v4 = vld [vmem:[%s2641_s8 + $0x100] sm:$0xff]   ;;  %v2367_v5 = vld [vmem:[%s2641_s8 + $0x48] sm:$0xff]  }
  0x41   : > { %v2368_v6 = vld [vmem:[%s2641_s8 + $0x108] sm:$0xff]   ;;  %v2369_v7 = vld [vmem:[%s2641_s8 + $0x50] sm:$0xff]   ;;  %v2371_v9 = vld [vmem:[%s2641_s8 + $0x58] sm:$0xff]  }
  0x42   : > { %v2370_v8 = vld [vmem:[%s2641_s8 + $0x110] sm:$0xff]   ;;  %v2372_v10 = vld [vmem:[%s2641_s8 + $0x118] sm:$0xff]   ;;  %v2373_v11 = vld [vmem:[%s2641_s8 + $0x60] sm:$0xff]  }
  0x43   : > { %2161 = vmatmul.mubr.msk.bf16.vlgmr.msra.gmra.mxu0 %vm990_vm0, %v2351_v53  ;;  %2209 = vmatmul.mubr.msk.bf16.vlgmr.msra.gmra.mxu1 %vm990_vm0, %v2352_v54  ;;  %v2374_v12 = vld [vmem:[%s2641_s8 + $0x120] sm:$0xff]   ;;  %v2375_v13 = vld [vmem:[%s2641_s8 + $0x68] sm:$0xff]   ;;  %v2377_v15 = vld [vmem:[%s2641_s8 + $0x70] sm:$0xff]  }
  0x44   : > { %2164 = vmatprep.mubr.msk.bf16.mxu0 %vm990_vm0, %v2353_v55  ;;  %2212 = vmatprep.mubr.msk.bf16.mxu1 %vm990_vm0, %v2354_v56  ;;  %v2376_v14 = vld [vmem:[%s2641_s8 + $0x128] sm:$0xff]   ;;  %v2378_v16 = vld [vmem:[%s2641_s8 + $0x130] sm:$0xff]   ;;  %v2379_v17 = vld [vmem:[%s2641_s8 + $0x78] sm:$0xff]  }
  0x45   : > { %v2380_v18 = vld [vmem:[%s2641_s8 + $0x138] sm:$0xff]   ;;  %v2381_v19 = vld [vmem:[%s2641_s8 + $0x80] sm:$0xff]   ;;  %v2383_v21 = vld [vmem:[%s2641_s8 + $0x88] sm:$0xff]  }
  0x46   : > { %v2382_v20 = vld [vmem:[%s2641_s8 + $0x140] sm:$0xff]   ;;  %v2384_v22 = vld [vmem:[%s2641_s8 + $0x148] sm:$0xff]   ;;  %v2385_v23 = vld [vmem:[%s2641_s8 + $0x90] sm:$0xff]  }
  0x47   : > { %v2386_v24 = vld [vmem:[%s2641_s8 + $0x150] sm:$0xff]   ;;  %v2387_v25 = vld [vmem:[%s2641_s8 + $0x98] sm:$0xff]   ;;  %v2389_v27 = vld [vmem:[%s2641_s8 + $0xa0] sm:$0xff]  }
  0x48   : > { %v2388_v26 = vld [vmem:[%s2641_s8 + $0x158] sm:$0xff]   ;;  %v2390_v28 = vld [vmem:[%s2641_s8 + $0x160] sm:$0xff]   ;;  %v2391_v29 = vld [vmem:[%s2641_s8 + $0xa8] sm:$0xff]  }
  0x49   : > { %v2392_v30 = vld [vmem:[%s2641_s8 + $0x168] sm:$0xff]   ;;  %v2393_v31 = vld [vmem:[%s2641_s8 + $0xb0] sm:$0xff]   ;;  %v2395_v33 = vld [vmem:[%s2641_s8 + $0xb8] sm:$0xff]  }
  0x4a   : > { %v2394_v32 = vld [vmem:[%s2641_s8 + $0x170] sm:$0xff]   ;;  %v2396_v34 = vld [vmem:[%s2641_s8 + $0x178] sm:$0xff]  }
  0x4b   : > { %2165 = vmatmul.mubr.msk.bf16.gmra.mxu0 %vm990_vm0, %v2355_v57  ;;  %2213 = vmatmul.mubr.msk.bf16.gmra.mxu1 %vm990_vm0, %v2356_v58 }
  0x4c   : > { %2168 = vmatprep.mubr.msk.bf16.mxu0 %vm990_vm0, %v2357_v59  ;;  %2216 = vmatprep.mubr.msk.bf16.mxu1 %vm990_vm0, %v2358_v60 }
  0x53   : > { %2169 = vmatmul.mubr.msk.bf16.gmra.mxu0 %vm990_vm0, %v2359_v61  ;;  %2217 = vmatmul.mubr.msk.bf16.gmra.mxu1 %vm990_vm0, %v2360_v62 }
  0x54   : > { %2172 = vmatprep.mubr.msk.bf16.mxu0 %vm990_vm0, %v2361_v63  ;;  %2220 = vmatprep.mubr.msk.bf16.mxu1 %vm990_vm0, %v2362_v0 }
  0x5b   : > { %2173 = vmatmul.mubr.msk.bf16.gmra.mxu0 %vm990_vm0, %v2363_v1  ;;  %2221 = vmatmul.mubr.msk.bf16.gmra.mxu1 %vm990_vm0, %v2364_v2 }
  0x5c   : > { %2176 = vmatprep.mubr.msk.bf16.mxu0 %vm990_vm0, %v2365_v3  ;;  %2224 = vmatprep.mubr.msk.bf16.mxu1 %vm990_vm0, %v2366_v4 }
  0x63   : > { %2177 = vmatmul.mubr.msk.bf16.gmra.mxu0 %vm990_vm0, %v2367_v5  ;;  %2225 = vmatmul.mubr.msk.bf16.gmra.mxu1 %vm990_vm0, %v2368_v6 }
  0x64   : > { %2180 = vmatprep.mubr.msk.bf16.mxu0 %vm990_vm0, %v2369_v7  ;;  %2228 = vmatprep.mubr.msk.bf16.mxu1 %vm990_vm0, %v2370_v8 }
  0x6b   : > { %2181 = vmatmul.mubr.msk.bf16.gmra.mxu0 %vm990_vm0, %v2371_v9  ;;  %2229 = vmatmul.mubr.msk.bf16.gmra.mxu1 %vm990_vm0, %v2372_v10 }
  0x6c   : > { %2184 = vmatprep.mubr.msk.bf16.mxu0 %vm990_vm0, %v2373_v11  ;;  %2232 = vmatprep.mubr.msk.bf16.mxu1 %vm990_vm0, %v2374_v12 }
  0x73   : > { %2185 = vmatmul.mubr.msk.bf16.gmra.mxu0 %vm990_vm0, %v2375_v13  ;;  %2233 = vmatmul.mubr.msk.bf16.gmra.mxu1 %vm990_vm0, %v2376_v14 }
  0x74   : > { %2188 = vmatprep.mubr.msk.bf16.mxu0 %vm990_vm0, %v2377_v15  ;;  %2236 = vmatprep.mubr.msk.bf16.mxu1 %vm990_vm0, %v2378_v16 }
  0x7b   : > { %2189 = vmatmul.mubr.msk.bf16.gmra.mxu0 %vm990_vm0, %v2379_v17  ;;  %2237 = vmatmul.mubr.msk.bf16.gmra.mxu1 %vm990_vm0, %v2380_v18 }
  0x7c   : > { %2192 = vmatprep.mubr.msk.bf16.mxu0 %vm990_vm0, %v2381_v19  ;;  %2240 = vmatprep.mubr.msk.bf16.mxu1 %vm990_vm0, %v2382_v20 }
  0x83   : > { %2193 = vmatmul.mubr.msk.bf16.gmra.mxu0 %vm990_vm0, %v2383_v21  ;;  %2241 = vmatmul.mubr.msk.bf16.gmra.mxu1 %vm990_vm0, %v2384_v22 }
  0x84   : > { %2196 = vmatprep.mubr.msk.bf16.mxu0 %vm990_vm0, %v2385_v23  ;;  %2244 = vmatprep.mubr.msk.bf16.mxu1 %vm990_vm0, %v2386_v24 }
  0x8b   : > { %2197 = vmatmul.mubr.msk.bf16.gmra.mxu0 %vm990_vm0, %v2387_v25  ;;  %2245 = vmatmul.mubr.msk.bf16.gmra.mxu1 %vm990_vm0, %v2388_v26 }
  0x8c   : > { %2200 = vmatprep.mubr.msk.bf16.mxu0 %vm990_vm0, %v2389_v27  ;;  %2248 = vmatprep.mubr.msk.bf16.mxu1 %vm990_vm0, %v2390_v28 }
  0x93   : > { %2201 = vmatmul.mubr.msk.bf16.gmra.mxu0 %vm990_vm0, %v2391_v29  ;;  %2249 = vmatmul.mubr.msk.bf16.gmra.mxu1 %vm990_vm0, %v2392_v30 }
  0x94   : > { %2204 = vmatprep.mubr.msk.bf16.mxu0 %vm990_vm0, %v2393_v31  ;;  %2252 = vmatprep.mubr.msk.bf16.mxu1 %vm990_vm0, %v2394_v32 }
  0x9b   : > { %2205 = vmatmul.mubr.msk.bf16.gmra.mxu0 %vm990_vm0, %v2395_v33  ;;  %2253 = vmatmul.mubr.msk.bf16.gmra.mxu1 %vm990_vm0, %v2396_v34 }
 0x103   : > { %v2162_v35 = vpop.f32.mrf.mxu0  ;;  %v2210_v36 = vpop.f32.mrf.mxu1 }
 0x104   : > { %v1554_v49 = vmax.f32 %v2162_v35, 0.0  ;;  %v1602_v50 = vmax.f32 %v2210_v36, 0.0 }
 0x105   : > { %v1169_v37 = vpop.f32.mrf.mxu0  ;;  %v1361_v38 = vpop.f32.mrf.mxu1 }
 0x106   : > { %v1552_v43 = vmax.f32 %v1169_v37, 0.0  ;;  %v1600_v44 = vmax.f32 %v1361_v38, 0.0 }
 0x107   : > { %v2163_v39 = vpop.f32.mrf.mxu0  ;;  %v2211_v40 = vpop.f32.mrf.mxu1 }
 0x108   : > { %v1555_v53 = vmax.f32 %v2163_v39, 0.0  ;;  %v1603_v56 = vmax.f32 %v2211_v40, 0.0 }
 0x109   : > { %v1172_v41 = vpop.f32.mrf.mxu0  ;;  %v1364_v42 = vpop.f32.mrf.mxu1 }
 0x10a   : > { %v1553_v45 = vmax.f32 %v1172_v41, 0.0  ;;  %v1601_v46 = vmax.f32 %v1364_v42, 0.0 }
 0x10b   : > { %v2166_v47 = vpop.f32.mrf.mxu0  ;;  %v2214_v48 = vpop.f32.mrf.mxu1 }
 0x10c   : > { %v1649_v51 = vadd.f32 %v1553_v45, %v1552_v43  ;;  %v1717_v52 = vadd.f32 %v1601_v46, %v1600_v44  ;;  %v1558_v9 = vmax.f32 %v2166_v47, 0.0  ;;  %v1606_v10 = vmax.f32 %v2214_v48, 0.0 }
 0x10d   : > { %v1185_v54 = vpop.f32.mrf.mxu0  ;;  %v1377_v55 = vpop.f32.mrf.mxu1 }
 0x10e   : > { %v1650_v57 = vadd.f32 %v1649_v51, %v1554_v49  ;;  %v1718_v58 = vadd.f32 %v1717_v52, %v1602_v50  ;;  %v1604_v59 = vmax.f32 %v1377_v55, 0.0  ;;  %v1556_v62 = vmax.f32 %v1185_v54, 0.0 }
 0x10f   : > { %v2167_v60 = vpop.f32.mrf.mxu0  ;;  %v2215_v61 = vpop.f32.mrf.mxu1 }
 0x110   : > { %v1651_v63 = vadd.f32 %v1650_v57, %v1555_v53  ;;  %v1719_v0 = vadd.f32 %v1718_v58, %v1603_v56  ;;  %v1559_v13 = vmax.f32 %v2167_v60, 0.0  ;;  %v1607_v16 = vmax.f32 %v2215_v61, 0.0 }
 0x111   : > { %v1188_v1 = vpop.f32.mrf.mxu0  ;;  %v1380_v2 = vpop.f32.mrf.mxu1 }
 0x112   : > { %v1652_v3 = vadd.f32 %v1651_v63, %v1556_v62  ;;  %v1720_v4 = vadd.f32 %v1719_v0, %v1604_v59  ;;  %v1557_v5 = vmax.f32 %v1188_v1, 0.0  ;;  %v1605_v6 = vmax.f32 %v1380_v2, 0.0 }
 0x113   : > { %v2170_v7 = vpop.f32.mrf.mxu0  ;;  %v2218_v8 = vpop.f32.mrf.mxu1 }
 0x114   : > { %v1653_v11 = vadd.f32 %v1652_v3, %v1557_v5  ;;  %v1721_v12 = vadd.f32 %v1720_v4, %v1605_v6  ;;  %v1562_v33 = vmax.f32 %v2170_v7, 0.0  ;;  %v1610_v34 = vmax.f32 %v2218_v8, 0.0 }
 0x115   : > { %v1201_v14 = vpop.f32.mrf.mxu0  ;;  %v1393_v15 = vpop.f32.mrf.mxu1 }
 0x116   : > { %v1654_v17 = vadd.f32 %v1653_v11, %v1558_v9  ;;  %v1722_v18 = vadd.f32 %v1721_v12, %v1606_v10  ;;  %v1608_v19 = vmax.f32 %v1393_v15, 0.0  ;;  %v1560_v22 = vmax.f32 %v1201_v14, 0.0 }
 0x117   : > { %v2171_v20 = vpop.f32.mrf.mxu0  ;;  %v2219_v21 = vpop.f32.mrf.mxu1 }
 0x118   : > { %v1655_v23 = vadd.f32 %v1654_v17, %v1559_v13  ;;  %v1723_v24 = vadd.f32 %v1722_v18, %v1607_v16  ;;  %v1563_v39 = vmax.f32 %v2171_v20, 0.0  ;;  %v1611_v40 = vmax.f32 %v2219_v21, 0.0 }
 0x119   : > { %v1204_v25 = vpop.f32.mrf.mxu0  ;;  %v1396_v26 = vpop.f32.mrf.mxu1 }
 0x11a   : > { %v1656_v27 = vadd.f32 %v1655_v23, %v1560_v22  ;;  %v1724_v28 = vadd.f32 %v1723_v24, %v1608_v19  ;;  %v1561_v29 = vmax.f32 %v1204_v25, 0.0  ;;  %v1609_v30 = vmax.f32 %v1396_v26, 0.0 }
 0x11b   : > { %v2174_v31 = vpop.f32.mrf.mxu0  ;;  %v2222_v32 = vpop.f32.mrf.mxu1 }
 0x11c   : > { %v1657_v35 = vadd.f32 %v1656_v27, %v1561_v29  ;;  %v1725_v36 = vadd.f32 %v1724_v28, %v1609_v30  ;;  %v1566_v2 = vmax.f32 %v2174_v31, 0.0  ;;  %v1614_v14 = vmax.f32 %v2222_v32, 0.0 }
 0x11d   : > { %v1217_v37 = vpop.f32.mrf.mxu0  ;;  %v1409_v38 = vpop.f32.mrf.mxu1 }
 0x11e   : > { %v1658_v41 = vadd.f32 %v1657_v35, %v1562_v33  ;;  %v1726_v42 = vadd.f32 %v1725_v36, %v1610_v34  ;;  %v1564_v60 = vmax.f32 %v1217_v37, 0.0  ;;  %v1612_v6 = vmax.f32 %v1409_v38, 0.0 }
 0x11f   : > { %v2175_v43 = vpop.f32.mrf.mxu0  ;;  %v2223_v44 = vpop.f32.mrf.mxu1 }
 0x120   : > { %v2746_v45 = vadd.f32 %v1658_v41, %v1563_v39  ;;  %v2748_v46 = vadd.f32 %v1726_v42, %v1611_v40  ;;  %v1567_v10 = vmax.f32 %v2175_v43, 0.0  ;;  %v1615_v26 = vmax.f32 %v2223_v44, 0.0 }
 0x121   : > { %v1220_v47 = vpop.f32.mrf.mxu0  ;;  %v1412_v48 = vpop.f32.mrf.mxu1 }
 0x122   : > { %v1565_v57 = vmax.f32 %v1220_v47, 0.0  ;;  %v1613_v3 = vmax.f32 %v1412_v48, 0.0 }
 0x123   : > { %v2750_v49 = vpop.f32.mrf.mxu0  ;;  %v2752_v50 = vpop.f32.mrf.mxu1 }
 0x124   : > { %v1666_v63 = vadd.f32 %v1565_v57, %v1564_v60  ;;  %v1734_v11 = vadd.f32 %v1613_v3, %v1612_v6  ;;  %v1570_v60 = vmax.f32 %v2750_v49, 0.0 }
 0x125   : > { %v1233_v51 = vpop.f32.mrf.mxu0  ;;  %v2754_v52 = vpop.f32.mrf.mxu1 }
 0x126   : > { %v1667_v7 = vadd.f32 %v1666_v63, %v1566_v2  ;;  %v1735_v18 = vadd.f32 %v1734_v11, %v1614_v14  ;;  %v1568_v19 = vmax.f32 %v1233_v51, 0.0  ;;  %v1616_v35 = vmax.f32 %v2754_v52, 0.0 }
 0x127   : > { %v2756_v53 = vpop.f32.mrf.mxu0  ;;  %v2758_v54 = vpop.f32.mrf.mxu1 }
 0x128   : > { %v1668_v15 = vadd.f32 %v1667_v7, %v1567_v10  ;;  %v1736_v36 = vadd.f32 %v1735_v18, %v1615_v26 }
 0x129   : > { %v1236_v55 = vpop.f32.mrf.mxu0  ;;  %v2760_v56 = vpop.f32.mrf.mxu1 }
 0x12a   : > { %v1669_v27 = vadd.f32 %v1668_v15, %v1568_v19  ;;  %v1569_v28 = vmax.f32 %v1236_v55, 0.0  ;;  %v1737_v63 = vadd.f32 %v1736_v36, %v1616_v35  ;;  %v1617_v2 = vmax.f32 %v2760_v56, 0.0 }
 0x12b   : > { %v2762_v58 = vpop.f32.mrf.mxu0  ;;  %v2764_v59 = vpop.f32.mrf.mxu1  ;;  %v1571_v15 = vmax.f32 %v2756_v53, 0.0  ;;  %v1618_v56 = vmax.f32 %v2752_v50, 0.0 }
 0x12c   : > { %v1670_v43 = vadd.f32 %v1669_v27, %v1569_v28 }
 0x12d   : > { %v2766_v61 = vpop.f32.mrf.mxu0  ;;  %v2768_v62 = vpop.f32.mrf.mxu1 }
 0x12e   : > { %v1620_v36 = vmax.f32 %v2768_v62, 0.0 }
 0x12f   : > { %v2770_v0 = vpop.f32.mrf.mxu0  ;;  %v2772_v1 = vpop.f32.mrf.mxu1 }
 0x131   : > { %v2774_v4 = vpop.f32.mrf.mxu0  ;;  %v2776_v5 = vpop.f32.mrf.mxu1 }
 0x133   : > { %v2186_v8 = vpop.f32.mrf.mxu0  ;;  %v2234_v9 = vpop.f32.mrf.mxu1 }
 0x134   : > { %v1578_v31 = vmax.f32 %v2186_v8, 0.0  ;;  %v1626_v33 = vmax.f32 %v2234_v9, 0.0  ;;  %v1671_v8 = vadd.f32 %v1670_v43, %v1570_v60 }
 0x135   : > { %v1265_v12 = vpop.f32.mrf.mxu0  ;;  %v1457_v13 = vpop.f32.mrf.mxu1 }
 0x136   : > { %v1576_v22 = vmax.f32 %v1265_v12, 0.0  ;;  %v1624_v23 = vmax.f32 %v1457_v13, 0.0  ;;  %v1672_v19 = vadd.f32 %v1671_v8, %v1571_v15 }
 0x137   : > { %v2187_v16 = vpop.f32.mrf.mxu0  ;;  %v2235_v17 = vpop.f32.mrf.mxu1 }
 0x138   : > { %v1579_v39 = vmax.f32 %v2187_v16, 0.0  ;;  %v1627_v40 = vmax.f32 %v2235_v17, 0.0  ;;  %v1738_v16 = vadd.f32 %v1737_v63, %v1617_v2 }
 0x139   : > { %v1268_v20 = vpop.f32.mrf.mxu0  ;;  %v1460_v21 = vpop.f32.mrf.mxu1 }
 0x13a   : > { %v1577_v24 = vmax.f32 %v1268_v20, 0.0  ;;  %v1625_v25 = vmax.f32 %v1460_v21, 0.0 }
 0x13b   : > { %v2190_v29 = vpop.f32.mrf.mxu0  ;;  %v2238_v30 = vpop.f32.mrf.mxu1 }
 0x13c   : > { %v1683_v34 = vadd.f32 %v1577_v24, %v1576_v22  ;;  %v1751_v32 = vadd.f32 %v1625_v25, %v1624_v23  ;;  %v1582_v13 = vmax.f32 %v2190_v29, 0.0  ;;  %v1739_v24 = vadd.f32 %v1738_v16, %v1618_v56 }
 0x13d   : > { %v1281_v37 = vpop.f32.mrf.mxu0  ;;  %v1473_v38 = vpop.f32.mrf.mxu1  ;;  %v1572_v25 = vmax.f32 %v2766_v61, 0.0  ;;  %v1630_v26 = vmax.f32 %v2238_v30, 0.0  ;;  %v1619_v29 = vmax.f32 %v2758_v54, 0.0 }
 0x13e   : > { %v1684_v41 = vadd.f32 %v1683_v34, %v1578_v31  ;;  %v1752_v42 = vadd.f32 %v1751_v32, %v1626_v33  ;;  %v1628_v47 = vmax.f32 %v1473_v38, 0.0  ;;  %v1580_v51 = vmax.f32 %v1281_v37, 0.0 }
 0x13f   : > { %v2191_v44 = vpop.f32.mrf.mxu0  ;;  %v2239_v48 = vpop.f32.mrf.mxu1  ;;  %v1673_v31 = vadd.f32 %v1672_v19, %v1572_v25  ;;  %v1573_v33 = vmax.f32 %v2774_v4, 0.0  ;;  %v1740_v37 = vadd.f32 %v1739_v24, %v1619_v29 }
 0x140   : > { %v1685_v55 = vadd.f32 %v1684_v41, %v1579_v39  ;;  %v1753_v57 = vadd.f32 %v1752_v42, %v1627_v40  ;;  %v1583_v20 = vmax.f32 %v2191_v44, 0.0  ;;  %v1631_v38 = vmax.f32 %v2239_v48, 0.0 }
 0x141   : > { %v1284_v52 = vpop.f32.mrf.mxu0  ;;  %v1476_v3 = vpop.f32.mrf.mxu1  ;;  %v1674_v41 = vadd.f32 %v1673_v31, %v1573_v33  ;;  %v1574_v44 = vmax.f32 %v2762_v58, 0.0  ;;  %v1741_v4 = vadd.f32 %v1740_v37, %v1620_v36 }
 0x142   : > { %v1686_v6 = vadd.f32 %v1685_v55, %v1580_v51  ;;  %v1581_v7 = vmax.f32 %v1284_v52, 0.0  ;;  %v1754_v9 = vadd.f32 %v1753_v57, %v1628_v47  ;;  %v1629_v10 = vmax.f32 %v1476_v3, 0.0 }
 0x143   : > { %v2781_v11 = vpop.f32.mrf.mxu0  ;;  %v2783_v12 = vpop.f32.mrf.mxu1  ;;  %v1621_v51 = vmax.f32 %v2776_v5, 0.0  ;;  %v1675_v52 = vadd.f32 %v1674_v41, %v1574_v44  ;;  %v1575_v5 = vmax.f32 %v2770_v0, 0.0 }
 0x144   : > { %v1687_v14 = vadd.f32 %v1686_v6, %v1581_v7  ;;  %v1755_v21 = vadd.f32 %v1754_v9, %v1629_v10  ;;  %v1586_v3 = vmax.f32 %v2781_v11, 0.0  ;;  %v1622_v11 = vmax.f32 %v2764_v59, 0.0 }
 0x145   : > { %v1297_v49 = vpop.f32.mrf.mxu0  ;;  %v1489_v17 = vpop.f32.mrf.mxu1  ;;  %v1742_v15 = vadd.f32 %v1741_v4, %v1621_v51 }
 0x146   : > { %v1688_v18 = vadd.f32 %v1687_v14, %v1582_v13  ;;  %v1756_v50 = vadd.f32 %v1755_v21, %v1630_v26  ;;  %v1584_v34 = vmax.f32 %v1297_v49, 0.0  ;;  %v1632_v42 = vmax.f32 %v1489_v17, 0.0 }
 0x147   : > { %v2787_v22 = vpop.f32.mrf.mxu0  ;;  %v2789_v23 = vpop.f32.mrf.mxu1  ;;  %v1676_v21 = vadd.f32 %v1675_v52, %v1575_v5  ;;  %v1743_v31 = vadd.f32 %v1742_v15, %v1622_v11 }
 0x148   : > { %v1689_v27 = vadd.f32 %v1688_v18, %v1583_v20  ;;  %v1757_v43 = vadd.f32 %v1756_v50, %v1631_v38  ;;  %v1587_v24 = vmax.f32 %v2787_v22, 0.0  ;;  %v1660_v22 = vrot.slane %v2746_v45, 4 }
 0x149   : > { %v1300_v28 = vpop.f32.mrf.mxu0  ;;  %v1492_v53 = vpop.f32.mrf.mxu1  ;;  %v1635_v4 = vmax.f32 %v2789_v23, 0.0 }
 0x14a   : > { %v1690_v39 = vadd.f32 %v1689_v27, %v1584_v34  ;;  %v1585_v40 = vmax.f32 %v1300_v28, 0.0  ;;  %v1758_v6 = vadd.f32 %v1757_v43, %v1632_v42  ;;  %v1633_v7 = vmax.f32 %v1492_v53, 0.0 }
 0x14b   : > { %v2198_v32 = vpop.f32.mrf.mxu0  ;;  %v2246_v35 = vpop.f32.mrf.mxu1  ;;  %v1634_v34 = vmax.f32 %v2783_v12, 0.0 }
 0x14c   : > { %v1691_v55 = vadd.f32 %v1690_v39, %v1585_v40  ;;  %v1590_v10 = vmax.f32 %v2198_v32, 0.0  ;;  %v1638_v13 = vmax.f32 %v2246_v35, 0.0  ;;  %v1759_v28 = vadd.f32 %v1758_v6, %v1633_v7 }
 0x14d   : > { %v1313_v61 = vpop.f32.mrf.mxu0  ;;  %v1505_v30 = vpop.f32.mrf.mxu1  ;;  %v1623_v40 = vmax.f32 %v2772_v1, 0.0  ;;  %v1728_v1 = vrot.slane %v2748_v46, 4  ;;  %v1661_v6 = vadd.f32 %v1660_v22, %v2746_v45 }
 0x14e   : > { %v1588_v62 = vmax.f32 %v1313_v61, 0.0  ;;  %v1636_v63 = vmax.f32 %v1505_v30, 0.0  ;;  %v1692_v16 = vadd.f32 %v1691_v55, %v1586_v3  ;;  %v1677_v61 = vrot.slane %v1676_v21, 4 }
 0x14f   : > { %v2199_v47 = vpop.f32.mrf.mxu0  ;;  %v2247_v54 = vpop.f32.mrf.mxu1  ;;  %v1760_v30 = vadd.f32 %v1759_v28, %v1634_v34  ;;  %v1744_v12 = vadd.f32 %v1743_v31, %v1623_v40  ;;  %v1662_v11 = vrot.slane %v1661_v6, 2  ;;  %v1729_v45 = vadd.f32 %v1728_v1, %v2748_v46 }
 0x150   : > { %v1591_v18 = vmax.f32 %v2199_v47, 0.0  ;;  %v1639_v56 = vmax.f32 %v2247_v54, 0.0  ;;  %v1693_v32 = vadd.f32 %v1692_v16, %v1587_v24  ;;  %v1678_v52 = vadd.f32 %v1677_v61, %v1676_v21 }
 0x151   : > { %v1316_v57 = vpop.f32.mrf.mxu0  ;;  %v1508_v60 = vpop.f32.mrf.mxu1  ;;  %v1761_v3 = vadd.f32 %v1760_v30, %v1635_v4  ;;  %v1745_v23 = vrot.slane %v1744_v12, 4  ;;  %v1663_v34 = vadd.f32 %v1662_v11, %v1661_v6 }
 0x152   : > { %v1589_v48 = vmax.f32 %v1316_v57, 0.0  ;;  %v1637_v2 = vmax.f32 %v1508_v60, 0.0  ;;  %v1694_v51 = vrot.slane %v1693_v32, 4 }
 0x153   : > { %v2202_v8 = vpop.f32.mrf.mxu0  ;;  %v2250_v9 = vpop.f32.mrf.mxu1  ;;  %v1746_v21 = vadd.f32 %v1745_v23, %v1744_v12  ;;  %v1664_v40 = vrot.slane %v1663_v34, 1 }
 0x154   : > { %v1700_v58 = vadd.f32 %v1589_v48, %v1588_v62  ;;  %v1768_v14 = vadd.f32 %v1637_v2, %v1636_v63  ;;  %v1594_v41 = vmax.f32 %v2202_v8, 0.0  ;;  %v1642_v42 = vmax.f32 %v2250_v9, 0.0 }
 0x155   : > { %v1329_v49 = vpop.f32.mrf.mxu0  ;;  %v1521_v17 = vpop.f32.mrf.mxu1  ;;  %v1665_v4 = vadd.f32 %v1664_v40, %v1663_v34 }
 0x156   : > { %v1701_v19 = vadd.f32 %v1700_v58, %v1590_v10  ;;  %v1769_v20 = vadd.f32 %v1768_v14, %v1638_v13  ;;  %v1640_v25 = vmax.f32 %v1521_v17, 0.0  ;;  %v1592_v53 = vmax.f32 %v1329_v49, 0.0 }
 0x157   : > { %v2203_v26 = vpop.f32.mrf.mxu0  ;;  %v2251_v27 = vpop.f32.mrf.mxu1  ;;  %v1695_v58 = vadd.f32 %v1694_v51, %v1693_v32  ;;  %v1679_v49 = vrot.slane %v1678_v52, 2  ;;  %v1762_v17 = vrot.slane %v1761_v3, 4  ;;  %v1747_v32 = vrot.slane %v1746_v21, 2 }
 0x158   : > { %v1702_v29 = vadd.f32 %v1701_v19, %v1591_v18  ;;  %v1770_v0 = vadd.f32 %v1769_v20, %v1639_v56  ;;  %v1595_v55 = vmax.f32 %v2203_v26, 0.0  ;;  %v1643_v57 = vmax.f32 %v2251_v27, 0.0 }
 0x159   : > { %v1332_v33 = vpop.f32.mrf.mxu0  ;;  %v1524_v50 = vpop.f32.mrf.mxu1  ;;  %v1696_v24 = vrot.slane %v1695_v58, 2  ;;  %v1748_v61 = vadd.f32 %v1747_v32, %v1746_v21 }
 0x15a   : > { %v1703_v35 = vadd.f32 %v1702_v29, %v1592_v53  ;;  %v1771_v36 = vadd.f32 %v1770_v0, %v1640_v25  ;;  %v1593_v37 = vmax.f32 %v1332_v33, 0.0  ;;  %v1641_v59 = vmax.f32 %v1524_v50, 0.0 }
 0x15b   : > { %v2206_v38 = vpop.f32.mrf.mxu0  ;;  %v2254_v39 = vpop.f32.mrf.mxu1  ;;  %v1763_v53 = vadd.f32 %v1762_v17, %v1761_v3  ;;  %v1680_v29 = vadd.f32 %v1679_v49, %v1678_v52  ;;  %v1730_v33 = vrot.slane %v1729_v45, 2  ;;  %v1697_v50 = vadd.f32 %v1696_v24, %v1695_v58 }
 0x15c   : > { %v1704_v43 = vadd.f32 %v1703_v35, %v1593_v37  ;;  %v1772_v47 = vadd.f32 %v1771_v36, %v1641_v59  ;;  %v1598_v18 = vmax.f32 %v2206_v38, 0.0  ;;  %v1646_v56 = vmax.f32 %v2254_v39, 0.0 }
 0x15d   : > { %v1345_v54 = vpop.f32.mrf.mxu0  ;;  %v1537_v44 = vpop.f32.mrf.mxu1  ;;  %v1764_v37 = vrot.slane %v1763_v53, 2  ;;  %v1681_v59 = vrot.slane %v1680_v29, 1  ;;  %v1731_v39 = vadd.f32 %v1730_v33, %v1729_v45  ;;  %v1698_v22 = vrot.slane %v1697_v50, 1 }
 0x15e   : > { %v1705_v60 = vadd.f32 %v1704_v43, %v1594_v41  ;;  %v1773_v62 = vadd.f32 %v1772_v47, %v1642_v42  ;;  %v1644_v63 = vmax.f32 %v1537_v44, 0.0  ;;  %v1596_v7 = vmax.f32 %v1345_v54, 0.0 }
 0x15f   : > { %v2207_v48 = vpop.f32.mrf.mxu0  ;;  %v2255_v2 = vpop.f32.mrf.mxu1  ;;  %v1765_v42 = vadd.f32 %v1764_v37, %v1763_v53  ;;  %v1682_v43 = vadd.f32 %v1681_v59, %v1680_v29  ;;  %v1732_v44 = vrot.slane %v1731_v39, 1  ;;  %v1699_v12 = vadd.f32 %v1698_v22, %v1697_v50 }
 0x160   : > { %v1706_v8 = vadd.f32 %v1705_v60, %v1595_v55  ;;  %v1774_v9 = vadd.f32 %v1773_v62, %v1643_v57  ;;  %v1599_v25 = vmax.f32 %v2207_v48, 0.0  ;;  %v1647_v26 = vmax.f32 %v2255_v2, 0.0 }
 0x161   : > { %v1348_v10 = vpop.f32.mrf.mxu0  ;;  %v1540_v13 = vpop.f32.mrf.mxu1  ;;  %v1749_v51 = vrot.slane %v1748_v61, 1  ;;  %v1766_v57 = vrot.slane %v1765_v42, 1  ;;  %v1794_v60 = vsel %vm1793_vm1, %v1682_v43, %v1665_v4  ;;  %v1733_v48 = vadd.f32 %v1732_v44, %v1731_v39 }
 0x162   : > { %v1597_v14 = vmax.f32 %v1348_v10, 0.0  ;;  %v1645_v5 = vmax.f32 %v1540_v13, 0.0  ;;  %v1707_v15 = vadd.f32 %v1706_v8, %v1596_v7  ;;  %v1775_v16 = vadd.f32 %v1774_v9, %v1644_v63  ;;  %v1648_v7 = vld [vmem:[#allocation2] sm:$0xff] }
 0x163   : > { %v1796_v2 = vsel %vm1795_vm2, %v1699_v12, %v1794_v60  ;;  %v1750_v1 = vadd.f32 %v1749_v51, %v1748_v61  ;;  %v1767_v3 = vadd.f32 %v1766_v57, %v1765_v42 }
 0x164   : > { %v1708_v19 = vadd.f32 %v1707_v15, %v1597_v14  ;;  %v1776_v20 = vadd.f32 %v1775_v16, %v1645_v5 }
 0x166   : > { %v1709_v27 = vadd.f32 %v1708_v19, %v1598_v18  ;;  %v1777_v28 = vadd.f32 %v1776_v20, %v1646_v56 }
 0x168   : > { %v1710_v0 = vadd.f32 %v1709_v27, %v1599_v25  ;;  %v1778_v31 = vadd.f32 %v1777_v28, %v1647_v26 }
 0x16a   : > { %v1711_v35 = vrot.slane %v1710_v0, 4  ;;  %v1779_v36 = vrot.slane %v1778_v31, 4 }
 0x16c   : > { %v1712_v38 = vadd.f32 %v1711_v35, %v1710_v0  ;;  %v1780_v46 = vadd.f32 %v1779_v36, %v1778_v31 }
 0x16e   : > { %v1713_v30 = vrot.slane %v1712_v38, 2  ;;  %v1781_v41 = vrot.slane %v1780_v46, 2 }
 0x170   : > { %v1714_v47 = vadd.f32 %v1713_v30, %v1712_v38  ;;  %v1782_v54 = vadd.f32 %v1781_v41, %v1780_v46 }
 0x172   : > { %v1715_v55 = vrot.slane %v1714_v47, 1  ;;  %v1783_v63 = vrot.slane %v1782_v54, 1 }
 0x174   : > { %v1716_v62 = vadd.f32 %v1715_v55, %v1714_v47  ;;  %v1784_v8 = vadd.f32 %v1783_v63, %v1782_v54 }
 0x176   : > { %v1798_v52 = vsel %vm1797_vm3, %v1716_v62, %v1796_v2 }
 0x177   : > { %v1800_v6 = vsel %vm1799_vm4, %v1733_v48, %v1798_v52 }
 0x178   : > { %v1802_v9 = vsel %vm1801_vm5, %v1750_v1, %v1800_v6 }
 0x179   : > { %v1804_v10 = vsel %vm1803_vm6, %v1767_v3, %v1802_v9  ;;  %1813 = sbr.rel (%p2082_p10) target bundleno = 611 (0x263), region = 85 }
 0x17a   : > { %v1806_v13 = vsel %vm1805_vm7, %v1784_v8, %v1804_v10 }
 0x17b   : > { %v1808_v23 = vadd.f32 %v1806_v13, %v1648_v7 }
 0x17d   : > { %1809 = vst [vmem:[#allocation2] sm:$0xff] %v1808_v23 }
 0x17e   : > { %v1831_v58 = vld [vmem:[%s2894_s2 + $0x78] sm:$0xff]  ;;  %v2466_v14 = vmov 0.0   ;;  %v1830_v5 = vld [vmem:[%s2894_s2 + $0x70] sm:$0xff]  ;;  %vm2467_vm8 = vmmov 0   ;;  %v1829_v15 = vld [vmem:[%s2894_s2 + $0x68] sm:$0xff] }
 0x17f   : > { %2256 = vmatprep.subr.mxu0 %v2466_v14  ;;  %2288 = vmatprep.mubr.msk.f32.mxu0 %vm2467_vm8, %v2466_v14  ;;  %v1828_v16 = vld [vmem:[%s2894_s2 + $0x60] sm:$0xff]  ;;  %v1827_v49 = vld [vmem:[%s2894_s2 + $0x58] sm:$0xff]  ;;  %v1826_v17 = vld [vmem:[%s2894_s2 + $0x50] sm:$0xff] }
 0x180   : > { %2257 = vmatpush3.msra.mxu0 %v1831_v58  ;;  %v1825_v18 = vld [vmem:[%s2894_s2 + $0x48] sm:$0xff]  ;;  %v1824_v56 = vld [vmem:[%s2894_s2 + $0x40] sm:$0xff]  ;;  %v1823_v19 = vld [vmem:[%s2894_s2 + $0x38] sm:$0xff] }
 0x181   : > { %2258 = vmatprep.subr.mxu0 %v2466_v14  ;;  %v1822_v20 = vld [vmem:[%s2894_s2 + $0x30] sm:$0xff]  ;;  %v1821_v11 = vld [vmem:[%s2894_s2 + $0x28] sm:$0xff]  ;;  %v1820_v45 = vld [vmem:[%s2894_s2 + $0x20] sm:$0xff] }
 0x182   : > { %2259 = vmatpush3.msra.mxu0 %v1830_v5  ;;  %v1819_v21 = vld [vmem:[%s2894_s2 + $0x18] sm:$0xff]  ;;  %v1818_v24 = vld [vmem:[%s2894_s2 + $0x10] sm:$0xff]  ;;  %v1817_v26 = vld [vmem:[%s2894_s2 + $0x8] sm:$0xff] }
 0x183   : > { %2260 = vmatprep.subr.mxu0 %v2466_v14  ;;  %v1816_v27 = vld [vmem:[%s2894_s2] sm:$0xff] }
 0x184   : > { %2261 = vmatpush3.msra.mxu0 %v1829_v15  ;;  %v1814_v25 = vld [vmem:[#allocation2] sm:$0xff] }
 0x185   : > { %2262 = vmatprep.subr.mxu0 %v2466_v14  ;;  %v1815_v28 = vmul.f32 0.00390625, %v1814_v25  ;;  %v2083_v53 = vld [vmem:[%s2895_s3] ss:$0 sm:$0xff] }
 0x186   : > { %2263 = vmatpush3.msra.mxu0 %v1828_v16 }
 0x187   : > { %2264 = vmatprep.subr.mxu0 %v2466_v14 }
 0x188   : > { %2265 = vmatpush3.msra.mxu0 %v1827_v49 }
 0x189   : > { %2266 = vmatprep.subr.mxu0 %v2466_v14 }
 0x18a   : > { %2267 = vmatpush3.msra.mxu0 %v1826_v17 }
 0x18b   : > { %2268 = vmatprep.subr.mxu0 %v2466_v14 }
 0x18c   : > { %2269 = vmatpush3.msra.mxu0 %v1825_v18 }
 0x18d   : > { %2270 = vmatprep.subr.mxu0 %v2466_v14 }
 0x18e   : > { %2271 = vmatpush3.msra.mxu0 %v1824_v56 }
 0x18f   : > { %2272 = vmatprep.subr.mxu0 %v2466_v14 }
 0x190   : > { %2273 = vmatpush3.msra.mxu0 %v1823_v19 }
 0x191   : > { %2274 = vmatprep.subr.mxu0 %v2466_v14 }
 0x192   : > { %2275 = vmatpush3.msra.mxu0 %v1822_v20 }
 0x193   : > { %2276 = vmatprep.subr.mxu0 %v2466_v14 }
 0x194   : > { %2277 = vmatpush3.msra.mxu0 %v1821_v11 }
 0x195   : > { %2278 = vmatprep.subr.mxu0 %v2466_v14 }
 0x196   : > { %2279 = vmatpush3.msra.mxu0 %v1820_v45 }
 0x197   : > { %2280 = vmatprep.subr.mxu0 %v2466_v14 }
 0x198   : > { %2281 = vmatpush3.msra.mxu0 %v1819_v21 }
 0x199   : > { %2282 = vmatprep.subr.mxu0 %v2466_v14 }
 0x19a   : > { %2283 = vmatpush3.msra.mxu0 %v1818_v24 }
 0x19b   : > { %2284 = vmatprep.subr.mxu0 %v2466_v14 }
 0x19c   : > { %2285 = vmatpush3.msra.mxu0 %v1817_v26 }
 0x19d   : > { %2286 = vmatprep.subr.mxu0 %v2466_v14 }
 0x19e   : > { %2287 = vmatpush3.msra.mxu0 %v1816_v27 }
 0x19f   : > { %2289 = vmatmul.mubr.f32.vlgmr.msra.gmra.mxu0 %v1815_v28 }
 0x25f   : > { %v1905_v29 = vpop.f32.mrf.mxu0 }
 0x260   : > { %v1906_v0 = vadd.f32 %v2083_v53, %v1905_v29 }
 0x261   : > { %v2290_v31 = vpop.f32.mrf.mxu0 }
 0x262   : > { %1909 = vst [vmem:[#allocation4] sm:$0xff] %v1906_v0 }
 0x263 PF: > { %p2862_p11 = scmp.eq.s32.totalorder %s1978_s20, 2  ;;  %s2468_s8 = smov [#allocation4]  }
 0x264   : > { %s1919_s9 = sshll.u32 %s2468_s8, 4  ;;  %s1920_s9 = int_to_ptr.vmem [resolvable:$true] %s1919_s9 }
 0x265   : > { %s2397_s10 = scalar_lea.vmem %s1920_s9, 128  ;;  %p2404_p1 = scmp.lt.s32.totalorder %s1920_s9, %s1920_s9 }
 0x266   : > { %p2398_p12 = scmp.ne.s32.totalorder %s1920_s9, %s2397_s10  ;;  %p2405_p2 = scmp.lt.s32.totalorder %s2397_s10, %s2397_s10 }
 0x268   : > { %p2399_p13 = pnand %p2398_p12, %p2862_p11  ;;  %p2406_p3 = por %p2405_p2, %p2404_p1 }
 0x26a   : > { %p2400_p0 = pneg %p2399_p13 }
 0x26c   : > { %p2407_p4 = pnand %p2406_p3, %p2400_p0 }
 0x26e   : > { %2410 = shalt.err (!%p2407_p4)
}
 0x26f   : > { %2298 = dma.vmem_to_hbm [thread:$0]  (%p2862_p11), %s1920_s9, 128, %s2896_s4, [#allocation5]  }
 0x270   : > { %2442 = dma.done.wait (%p2862_p11), [#allocation5], 128  }
 0x271   : > { %2444 = vsyncadd (%p2862_p11), [#allocation5], 4294967168 }
 0x272 PF: > { %s15_s19 = sadd.s32 1, %s2463_s19   ;;  %s2898_s15 = smov %s2451_s16 }
 0x273   : > { %p12_p5 = scmp.ge.s32.totalorder %s15_s19, 5   ;;  %s2899_s16 = smov %s2530_s24 }
 0x274   : > { %s2900_s17 = smov %s2459_s18  ;;  %s2901_s18 = smov %s2903_s21 }
 0x275   :  { %14 = sbr.rel (!%p12_p5) target bundleno = 3 (0x3), region = 118 }
 0x27a   :  { %1932 = vsyncpa [#allocation5], 1 }
 0x27b   :  { %1934 = vsyncpa [#allocation5 + $0x1], 1 }

</bundles_post_ra>
